<compile_context>
chip_gen: v7x
topology: tpu7x:2x2x1
jax: 0.10.0
libtpu: 0.0.40
codegen_flags: <defaults>
</compile_context>

<pallas_src>
import functools

import numpy as np
import jax
import jax.numpy as jnp
from jax import lax
from jax.experimental import pallas as pl
from jax.experimental.pallas import tpu as pltpu

# Tap order t = dy*3 + dx (dy outer, dx inner). Matches the weight reshape
# (C_out, dy, dx, C_in) -> (C_out, 9*C_in), i.e. patch row index = t*C + cin.
_OFFSETS = tuple((dy - 1, dx - 1) for dy in range(3) for dx in range(3))


def _border_masks(H, W):
    """(9, 1, H*W) f32 validity masks for SAME padding (center tap all-ones)."""
    ys, xs = np.meshgrid(np.arange(H), np.arange(W), indexing="ij")
    masks = []
    for oy, ox in _OFFSETS:
        valid = ((ys + oy >= 0) & (ys + oy < H) &
                 (xs + ox >= 0) & (xs + ox < W))
        masks.append(valid.reshape(1, H * W))
    return np.stack(masks, axis=0).astype(np.float32)


def _resblock_kernel(x_ref, m_ref, w1_ref, b1_ref, w2_ref, b2_ref, out_ref,
                     *, H, W, C):
    """One batch element per grid step, channel-major layout.

    x_ref  : (1, C, H*W)   flattened NCHW input
    m_ref  : (9, 1, H*W)   f32 border-validity masks, one per tap
    w*_ref : (C, 9*C)      conv weights reshaped for the fused im2col matmul
    b*_ref : (C, 1)        biases
    out_ref: (1, C, H*W)   flattened NCHW output
    """
    HW = H * W
    x = x_ref[0]          # (C, HW) -- conv1 input and residual identity
    m = m_ref[...]        # (9, 1, HW)

    def im2col(img):
        """(C, HW) -> (9*C, HW): 9 rolled+masked copies stacked on sublanes.

        NOTE: the roll+mask trick relies on every element that wraps around the
        HW axis landing on a mask-invalid output position.  This holds for any
        3x3 tap (|oy|,|ox| <= 1) with row-major (y*W + x) flattening, but would
        NOT automatically hold for dilation or larger kernel footprints.
        """
        blocks = []
        for t, (oy, ox) in enumerate(_OFFSETS):
            if oy == 0 and ox == 0:
                blocks.append(img)                      # center tap always valid
                continue
            shift = (-(oy * W + ox)) % HW               # static, non-negative
            shifted = pltpu.roll(img, shift, axis=1)    # XLU lane rotate
            blocks.append(shifted * m[t])               # (1, HW) mask broadcast
        return jnp.concatenate(blocks, axis=0)          # sublane-aligned concat

    # ---- conv1 (single K=9*C matmul) + bias + ReLU ----
    h = jnp.dot(w1_ref[...], im2col(x), preferred_element_type=jnp.float32)
    h = jnp.maximum(h + b1_ref[...], 0.0)

    # ---- conv2 (single K=9*C matmul) + bias + residual add ----
    y = jnp.dot(w2_ref[...], im2col(h), preferred_element_type=jnp.float32)
    out_ref[0] = (x + y + b2_ref[...]).astype(out_ref.dtype)


@jax.jit
def residual_block_nobn(x_nchw, w1, b1, w2, b2):
    """x_nchw: (N, C, H, W) f32; w: (C_out, C_in, 3, 3) OIHW; b: (C,)."""
    N, C, H, W = x_nchw.shape
    HW = H * W

    x_flat = x_nchw.reshape(N, C, HW)                        # free reshape
    # OIHW -> (C_out, dy, dx, cin) -> (C_out, 9*C_in); column order matches
    # the _OFFSETS tap order used when building the patch matrix.
    w1f = jnp.transpose(w1, (0, 2, 3, 1)).reshape(C, 9 * C)
    w2f = jnp.transpose(w2, (0, 2, 3, 1)).reshape(C, 9 * C)
    b1r = b1.reshape(C, 1)
    b2r = b2.reshape(C, 1)
    masks = jnp.asarray(_border_masks(H, W))                 # (9, 1, HW) const

    kernel = functools.partial(_resblock_kernel, H=H, W=W, C=C)

    out = pl.pallas_call(
        kernel,
        out_shape=jax.ShapeDtypeStruct((N, C, HW), x_nchw.dtype),
        grid_spec=pltpu.PrefetchScalarGridSpec(
            num_scalar_prefetch=0,
            grid=(N,),
            in_specs=[
                pl.BlockSpec((1, C, HW), lambda n: (n, 0, 0)),
                pl.BlockSpec((9, 1, HW), lambda n: (0, 0, 0)),
                pl.BlockSpec((C, 9 * C), lambda n: (0, 0)),
                pl.BlockSpec((C, 1), lambda n: (0, 0)),
                pl.BlockSpec((C, 9 * C), lambda n: (0, 0)),
                pl.BlockSpec((C, 1), lambda n: (0, 0)),
            ],
            out_specs=pl.BlockSpec((1, C, HW), lambda n: (n, 0, 0)),
        ),
        compiler_params=pltpu.CompilerParams(
            dimension_semantics=("parallel",),
        ),
    )(x_flat, masks, w1f, b1r, w2f, b2r)

    return out.reshape(N, C, H, W)


def _reference(x_nchw, w1, b1, w2, b2):
    dn = ("NCHW", "OIHW", "NCHW")
    y = lax.conv_general_dilated(
        x_nchw, w1, (1, 1), "SAME", dimension_numbers=dn,
        precision=lax.Precision.HIGHEST) + b1[None, :, None, None]
    y = jnp.maximum(y, 0.0)
    y = lax.conv_general_dilated(
        y, w2, (1, 1), "SAME", dimension_numbers=dn,
        precision=lax.Precision.HIGHEST) + b2[None, :, None, None]
    return x_nchw + y


def _init_params(key, nf):
    # Kaiming normal, fan_in mode, a=0 -> std = sqrt(2 / fan_in), then *0.1.
    fan_in = nf * 3 * 3
    std = (2.0 / fan_in) ** 0.5
    k1, k2, k3, k4 = jax.random.split(key, 4)
    w1 = jax.random.normal(k1, (nf, nf, 3, 3), jnp.float32) * std * 0.1  # OIHW
    w2 = jax.random.normal(k2, (nf, nf, 3, 3), jnp.float32) * std * 0.1
    # Module init zeroes biases; use small nonzero biases here so the bias-add
    # path in the kernel is actually exercised by the check.
    b1 = jax.random.normal(k3, (nf,), jnp.float32) * 0.1
    b2 = jax.random.normal(k4, (nf,), jnp.float32) * 0.1
    return w1, b1, w2, b2


if __name__ == "__main__":
    key = jax.random.PRNGKey(0)
    kx, kp = jax.random.split(key)

    N, C, H, W = 2, 64, 16, 16  # nf=64 default of ResidualBlockNoBN
    x_nchw = jax.random.normal(kx, (N, C, H, W), jnp.float32)
    w1, b1, w2, b2 = _init_params(kp, C)

    out = jax.block_until_ready(residual_block_nobn(x_nchw, w1, b1, w2, b2))
    assert out.shape == (N, C, H, W)

    ref = _reference(x_nchw, w1, b1, w2, b2)
    err = jnp.max(jnp.abs(out - ref))
    assert err < 1e-4, f"max abs error too large: {err}"

    print("KERNEL_OK")
</pallas_src>

<mosaic_0001>
module attributes {stable_mosaic.version = 11 : i64} {
  func.func @_resblock_kernel(%arg0: i32, %arg1: memref<1x64x256xf32, #tpu.memory_space<vmem>>, %arg2: memref<9x1x256xf32, #tpu.memory_space<vmem>>, %arg3: memref<64x576xf32, #tpu.memory_space<vmem>>, %arg4: memref<64x1xf32, #tpu.memory_space<vmem>>, %arg5: memref<64x576xf32, #tpu.memory_space<vmem>>, %arg6: memref<64x1xf32, #tpu.memory_space<vmem>>, %arg7: memref<1x64x256xf32, #tpu.memory_space<vmem>>) attributes {dimension_semantics = [#tpu.dimension_semantics<parallel>], iteration_bounds = array<i64: 2>, scalar_prefetch = 0 : i64, scratch_operands = 0 : i64, tpu.core_type = #tpu.core_type<tc>, window_params = [{transform_indices = @transform_0, window_bounds = array<i64: 1, 64, 256>}, {pipeline_mode = #tpu.pipeline_mode<synchronous>, transform_indices = @transform_1, window_bounds = array<i64: 9, 1, 256>}, {pipeline_mode = #tpu.pipeline_mode<synchronous>, transform_indices = @transform_2, window_bounds = array<i64: 64, 576>}, {pipeline_mode = #tpu.pipeline_mode<synchronous>, transform_indices = @transform_3, window_bounds = array<i64: 64, 1>}, {pipeline_mode = #tpu.pipeline_mode<synchronous>, transform_indices = @transform_4, window_bounds = array<i64: 64, 576>}, {pipeline_mode = #tpu.pipeline_mode<synchronous>, transform_indices = @transform_5, window_bounds = array<i64: 64, 1>}, {transform_indices = @transform_6, window_bounds = array<i64: 1, 64, 256>}]} {
    %c0 = arith.constant 0 : index
    %c0_0 = arith.constant 0 : index
    %c0_1 = arith.constant 0 : index
    %0 = vector.load %arg1[%c0, %c0_0, %c0_1] : memref<1x64x256xf32, #tpu.memory_space<vmem>>, vector<1x64x256xf32>
    %1 = vector.shape_cast %0 : vector<1x64x256xf32> to vector<64x256xf32>
    %c0_2 = arith.constant 0 : index
    %c0_3 = arith.constant 0 : index
    %c0_4 = arith.constant 0 : index
    %2 = vector.load %arg2[%c0_2, %c0_3, %c0_4] : memref<9x1x256xf32, #tpu.memory_space<vmem>>, vector<9x1x256xf32>
    %c0_5 = arith.constant 0 : index
    %c0_6 = arith.constant 0 : index
    %3 = vector.load %arg3[%c0_5, %c0_6] : memref<64x576xf32, #tpu.memory_space<vmem>>, vector<64x576xf32>
    %c17_i32 = arith.constant 17 : i32
    %4 = tpu.dynamic_rotate %1 by %c17_i32 dim 1 : vector<64x256xf32>, i32 -> vector<64x256xf32>
    %5 = vector.extract_strided_slice %2 {offsets = [0, 0, 0], sizes = [1, 1, 256], strides = [1, 1, 1]} : vector<9x1x256xf32> to vector<1x1x256xf32>
    %6 = vector.shape_cast %5 : vector<1x1x256xf32> to vector<1x256xf32>
    %7 = vector.broadcast %6 : vector<1x256xf32> to vector<64x256xf32>
    %8 = arith.mulf %4, %7 : vector<64x256xf32>
    %c16_i32 = arith.constant 16 : i32
    %9 = tpu.dynamic_rotate %1 by %c16_i32 dim 1 : vector<64x256xf32>, i32 -> vector<64x256xf32>
    %10 = vector.extract_strided_slice %2 {offsets = [1, 0, 0], sizes = [1, 1, 256], strides = [1, 1, 1]} : vector<9x1x256xf32> to vector<1x1x256xf32>
    %11 = vector.shape_cast %10 : vector<1x1x256xf32> to vector<1x256xf32>
    %12 = vector.broadcast %11 : vector<1x256xf32> to vector<64x256xf32>
    %13 = arith.mulf %9, %12 : vector<64x256xf32>
    %c15_i32 = arith.constant 15 : i32
    %14 = tpu.dynamic_rotate %1 by %c15_i32 dim 1 : vector<64x256xf32>, i32 -> vector<64x256xf32>
    %15 = vector.extract_strided_slice %2 {offsets = [2, 0, 0], sizes = [1, 1, 256], strides = [1, 1, 1]} : vector<9x1x256xf32> to vector<1x1x256xf32>
    %16 = vector.shape_cast %15 : vector<1x1x256xf32> to vector<1x256xf32>
    %17 = vector.broadcast %16 : vector<1x256xf32> to vector<64x256xf32>
    %18 = arith.mulf %14, %17 : vector<64x256xf32>
    %c1_i32 = arith.constant 1 : i32
    %19 = tpu.dynamic_rotate %1 by %c1_i32 dim 1 : vector<64x256xf32>, i32 -> vector<64x256xf32>
    %20 = vector.extract_strided_slice %2 {offsets = [3, 0, 0], sizes = [1, 1, 256], strides = [1, 1, 1]} : vector<9x1x256xf32> to vector<1x1x256xf32>
    %21 = vector.shape_cast %20 : vector<1x1x256xf32> to vector<1x256xf32>
    %22 = vector.broadcast %21 : vector<1x256xf32> to vector<64x256xf32>
    %23 = arith.mulf %19, %22 : vector<64x256xf32>
    %c255_i32 = arith.constant 255 : i32
    %24 = tpu.dynamic_rotate %1 by %c255_i32 dim 1 : vector<64x256xf32>, i32 -> vector<64x256xf32>
    %25 = vector.extract_strided_slice %2 {offsets = [5, 0, 0], sizes = [1, 1, 256], strides = [1, 1, 1]} : vector<9x1x256xf32> to vector<1x1x256xf32>
    %26 = vector.shape_cast %25 : vector<1x1x256xf32> to vector<1x256xf32>
    %27 = vector.broadcast %26 : vector<1x256xf32> to vector<64x256xf32>
    %28 = arith.mulf %24, %27 : vector<64x256xf32>
    %c241_i32 = arith.constant 241 : i32
    %29 = tpu.dynamic_rotate %1 by %c241_i32 dim 1 : vector<64x256xf32>, i32 -> vector<64x256xf32>
    %30 = vector.extract_strided_slice %2 {offsets = [6, 0, 0], sizes = [1, 1, 256], strides = [1, 1, 1]} : vector<9x1x256xf32> to vector<1x1x256xf32>
    %31 = vector.shape_cast %30 : vector<1x1x256xf32> to vector<1x256xf32>
    %32 = vector.broadcast %31 : vector<1x256xf32> to vector<64x256xf32>
    %33 = arith.mulf %29, %32 : vector<64x256xf32>
    %c240_i32 = arith.constant 240 : i32
    %34 = tpu.dynamic_rotate %1 by %c240_i32 dim 1 : vector<64x256xf32>, i32 -> vector<64x256xf32>
    %35 = vector.extract_strided_slice %2 {offsets = [7, 0, 0], sizes = [1, 1, 256], strides = [1, 1, 1]} : vector<9x1x256xf32> to vector<1x1x256xf32>
    %36 = vector.shape_cast %35 : vector<1x1x256xf32> to vector<1x256xf32>
    %37 = vector.broadcast %36 : vector<1x256xf32> to vector<64x256xf32>
    %38 = arith.mulf %34, %37 : vector<64x256xf32>
    %c239_i32 = arith.constant 239 : i32
    %39 = tpu.dynamic_rotate %1 by %c239_i32 dim 1 : vector<64x256xf32>, i32 -> vector<64x256xf32>
    %40 = vector.extract_strided_slice %2 {offsets = [8, 0, 0], sizes = [1, 1, 256], strides = [1, 1, 1]} : vector<9x1x256xf32> to vector<1x1x256xf32>
    %41 = vector.shape_cast %40 : vector<1x1x256xf32> to vector<1x256xf32>
    %42 = vector.broadcast %41 : vector<1x256xf32> to vector<64x256xf32>
    %43 = arith.mulf %39, %42 : vector<64x256xf32>
    %44 = tpu.concatenate %8, %13, %18, %23, %1, %28, %33, %38, %43 in 0 : vector<64x256xf32>, vector<64x256xf32>, vector<64x256xf32>, vector<64x256xf32>, vector<64x256xf32>, vector<64x256xf32>, vector<64x256xf32>, vector<64x256xf32>, vector<64x256xf32> -> vector<576x256xf32>
    %cst = arith.constant dense<0.000000e+00> : vector<64x256xf32>
    %45 = tpu.matmul %3, %44, %cst {dimension_numbers = #tpu.dot_dimension_numbers<[1], [0], [0], [1], [0, 0, 1, 1], [], []>} : vector<64x576xf32>, vector<576x256xf32>, vector<64x256xf32> -> vector<64x256xf32>
    %c0_7 = arith.constant 0 : index
    %c0_8 = arith.constant 0 : index
    %46 = vector.load %arg4[%c0_7, %c0_8] : memref<64x1xf32, #tpu.memory_space<vmem>>, vector<64x1xf32>
    %47 = vector.broadcast %46 : vector<64x1xf32> to vector<64x256xf32>
    %48 = arith.addf %45, %47 : vector<64x256xf32>
    %cst_9 = arith.constant 0.000000e+00 : f32
    %49 = vector.broadcast %cst_9 : f32 to vector<64x256xf32>
    %50 = arith.maximumf %48, %49 : vector<64x256xf32>
    %c0_10 = arith.constant 0 : index
    %c0_11 = arith.constant 0 : index
    %51 = vector.load %arg5[%c0_10, %c0_11] : memref<64x576xf32, #tpu.memory_space<vmem>>, vector<64x576xf32>
    %c17_i32_12 = arith.constant 17 : i32
    %52 = tpu.dynamic_rotate %50 by %c17_i32_12 dim 1 : vector<64x256xf32>, i32 -> vector<64x256xf32>
    %53 = vector.extract_strided_slice %2 {offsets = [0, 0, 0], sizes = [1, 1, 256], strides = [1, 1, 1]} : vector<9x1x256xf32> to vector<1x1x256xf32>
    %54 = vector.shape_cast %53 : vector<1x1x256xf32> to vector<1x256xf32>
    %55 = vector.broadcast %54 : vector<1x256xf32> to vector<64x256xf32>
    %56 = arith.mulf %52, %55 : vector<64x256xf32>
    %c16_i32_13 = arith.constant 16 : i32
    %57 = tpu.dynamic_rotate %50 by %c16_i32_13 dim 1 : vector<64x256xf32>, i32 -> vector<64x256xf32>
    %58 = vector.extract_strided_slice %2 {offsets = [1, 0, 0], sizes = [1, 1, 256], strides = [1, 1, 1]} : vector<9x1x256xf32> to vector<1x1x256xf32>
    %59 = vector.shape_cast %58 : vector<1x1x256xf32> to vector<1x256xf32>
    %60 = vector.broadcast %59 : vector<1x256xf32> to vector<64x256xf32>
    %61 = arith.mulf %57, %60 : vector<64x256xf32>
    %c15_i32_14 = arith.constant 15 : i32
    %62 = tpu.dynamic_rotate %50 by %c15_i32_14 dim 1 : vector<64x256xf32>, i32 -> vector<64x256xf32>
    %63 = vector.extract_strided_slice %2 {offsets = [2, 0, 0], sizes = [1, 1, 256], strides = [1, 1, 1]} : vector<9x1x256xf32> to vector<1x1x256xf32>
    %64 = vector.shape_cast %63 : vector<1x1x256xf32> to vector<1x256xf32>
    %65 = vector.broadcast %64 : vector<1x256xf32> to vector<64x256xf32>
    %66 = arith.mulf %62, %65 : vector<64x256xf32>
    %c1_i32_15 = arith.constant 1 : i32
    %67 = tpu.dynamic_rotate %50 by %c1_i32_15 dim 1 : vector<64x256xf32>, i32 -> vector<64x256xf32>
    %68 = vector.extract_strided_slice %2 {offsets = [3, 0, 0], sizes = [1, 1, 256], strides = [1, 1, 1]} : vector<9x1x256xf32> to vector<1x1x256xf32>
    %69 = vector.shape_cast %68 : vector<1x1x256xf32> to vector<1x256xf32>
    %70 = vector.broadcast %69 : vector<1x256xf32> to vector<64x256xf32>
    %71 = arith.mulf %67, %70 : vector<64x256xf32>
    %c255_i32_16 = arith.constant 255 : i32
    %72 = tpu.dynamic_rotate %50 by %c255_i32_16 dim 1 : vector<64x256xf32>, i32 -> vector<64x256xf32>
    %73 = vector.extract_strided_slice %2 {offsets = [5, 0, 0], sizes = [1, 1, 256], strides = [1, 1, 1]} : vector<9x1x256xf32> to vector<1x1x256xf32>
    %74 = vector.shape_cast %73 : vector<1x1x256xf32> to vector<1x256xf32>
    %75 = vector.broadcast %74 : vector<1x256xf32> to vector<64x256xf32>
    %76 = arith.mulf %72, %75 : vector<64x256xf32>
    %c241_i32_17 = arith.constant 241 : i32
    %77 = tpu.dynamic_rotate %50 by %c241_i32_17 dim 1 : vector<64x256xf32>, i32 -> vector<64x256xf32>
    %78 = vector.extract_strided_slice %2 {offsets = [6, 0, 0], sizes = [1, 1, 256], strides = [1, 1, 1]} : vector<9x1x256xf32> to vector<1x1x256xf32>
    %79 = vector.shape_cast %78 : vector<1x1x256xf32> to vector<1x256xf32>
    %80 = vector.broadcast %79 : vector<1x256xf32> to vector<64x256xf32>
    %81 = arith.mulf %77, %80 : vector<64x256xf32>
    %c240_i32_18 = arith.constant 240 : i32
    %82 = tpu.dynamic_rotate %50 by %c240_i32_18 dim 1 : vector<64x256xf32>, i32 -> vector<64x256xf32>
    %83 = vector.extract_strided_slice %2 {offsets = [7, 0, 0], sizes = [1, 1, 256], strides = [1, 1, 1]} : vector<9x1x256xf32> to vector<1x1x256xf32>
    %84 = vector.shape_cast %83 : vector<1x1x256xf32> to vector<1x256xf32>
    %85 = vector.broadcast %84 : vector<1x256xf32> to vector<64x256xf32>
    %86 = arith.mulf %82, %85 : vector<64x256xf32>
    %c239_i32_19 = arith.constant 239 : i32
    %87 = tpu.dynamic_rotate %50 by %c239_i32_19 dim 1 : vector<64x256xf32>, i32 -> vector<64x256xf32>
    %88 = vector.extract_strided_slice %2 {offsets = [8, 0, 0], sizes = [1, 1, 256], strides = [1, 1, 1]} : vector<9x1x256xf32> to vector<1x1x256xf32>
    %89 = vector.shape_cast %88 : vector<1x1x256xf32> to vector<1x256xf32>
    %90 = vector.broadcast %89 : vector<1x256xf32> to vector<64x256xf32>
    %91 = arith.mulf %87, %90 : vector<64x256xf32>
    %92 = tpu.concatenate %56, %61, %66, %71, %50, %76, %81, %86, %91 in 0 : vector<64x256xf32>, vector<64x256xf32>, vector<64x256xf32>, vector<64x256xf32>, vector<64x256xf32>, vector<64x256xf32>, vector<64x256xf32>, vector<64x256xf32>, vector<64x256xf32> -> vector<576x256xf32>
    %cst_20 = arith.constant dense<0.000000e+00> : vector<64x256xf32>
    %93 = tpu.matmul %51, %92, %cst_20 {dimension_numbers = #tpu.dot_dimension_numbers<[1], [0], [0], [1], [0, 0, 1, 1], [], []>} : vector<64x576xf32>, vector<576x256xf32>, vector<64x256xf32> -> vector<64x256xf32>
    %94 = arith.addf %1, %93 : vector<64x256xf32>
    %c0_21 = arith.constant 0 : index
    %c0_22 = arith.constant 0 : index
    %95 = vector.load %arg6[%c0_21, %c0_22] : memref<64x1xf32, #tpu.memory_space<vmem>>, vector<64x1xf32>
    %96 = vector.broadcast %95 : vector<64x1xf32> to vector<64x256xf32>
    %97 = arith.addf %94, %96 : vector<64x256xf32>
    %c0_23 = arith.constant 0 : index
    %c0_24 = arith.constant 0 : index
    %c0_25 = arith.constant 0 : index
    %98 = vector.load %arg7[%c0_23, %c0_24, %c0_25] : memref<1x64x256xf32, #tpu.memory_space<vmem>>, vector<1x64x256xf32>
    %99 = vector.shape_cast %98 : vector<1x64x256xf32> to vector<64x256xf32>
    %100 = vector.shape_cast %97 : vector<64x256xf32> to vector<1x64x256xf32>
    tpu.vector_store %arg7[%c0_23, %c0_24, %c0_25], %100 {strides = array<i32>} : memref<1x64x256xf32, #tpu.memory_space<vmem>>, vector<1x64x256xf32>,
    return
  }
  func.func @transform_0(%arg0: i32) -> (i32, i32, i32) {
    %c0_i32 = arith.constant 0 : i32
    %c0_i32_0 = arith.constant 0 : i32
    %c0_i32_1 = arith.constant 0 : i32
    return %arg0, %c0_i32, %c0_i32_0 : i32, i32, i32
  }
  func.func @transform_1(%arg0: i32) -> (i32, i32, i32) {
    %c0_i32 = arith.constant 0 : i32
    %c0_i32_0 = arith.constant 0 : i32
    %c0_i32_1 = arith.constant 0 : i32
    %c0_i32_2 = arith.constant 0 : i32
    return %c0_i32, %c0_i32_0, %c0_i32_1 : i32, i32, i32
  }
  func.func @transform_2(%arg0: i32) -> (i32, i32) {
    %c0_i32 = arith.constant 0 : i32
    %c0_i32_0 = arith.constant 0 : i32
    %c0_i32_1 = arith.constant 0 : i32
    return %c0_i32, %c0_i32_0 : i32, i32
  }
  func.func @transform_3(%arg0: i32) -> (i32, i32) {
    %c0_i32 = arith.constant 0 : i32
    %c0_i32_0 = arith.constant 0 : i32
    %c0_i32_1 = arith.constant 0 : i32
    return %c0_i32, %c0_i32_0 : i32, i32
  }
  func.func @transform_4(%arg0: i32) -> (i32, i32) {
    %c0_i32 = arith.constant 0 : i32
    %c0_i32_0 = arith.constant 0 : i32
    %c0_i32_1 = arith.constant 0 : i32
    return %c0_i32, %c0_i32_0 : i32, i32
  }
  func.func @transform_5(%arg0: i32) -> (i32, i32) {
    %c0_i32 = arith.constant 0 : i32
    %c0_i32_0 = arith.constant 0 : i32
    %c0_i32_1 = arith.constant 0 : i32
    return %c0_i32, %c0_i32_0 : i32, i32
  }
  func.func @transform_6(%arg0: i32) -> (i32, i32, i32) {
    %c0_i32 = arith.constant 0 : i32
    %c0_i32_0 = arith.constant 0 : i32
    %c0_i32_1 = arith.constant 0 : i32
    return %arg0, %c0_i32, %c0_i32_0 : i32, i32, i32
  }
}

</mosaic_0001>

<bundles_post_ra>
// kernel: residual_block_nobn.1
= control target key start
LH: loop header
LB: loop body
LE: loop exit
PB: predicated region body
PF: predicated region fallthrough
CT: control target
= control target key end

     0   :  { %s2906_s21 = smov 0   ;;  %s5076_s0 = inlined_call_operand.vmem [shape: f32[2,64,256], index: 0, kind: input, shape index: {}]   ;;  %s5077_s1 = inlined_call_operand.vmem [shape: f32[9,1,256], index: 1, kind: input, shape index: {}]   ;;  %s5078_s2 = inlined_call_operand.vmem [shape: f32[64,576], index: 2, kind: input, shape index: {}]   ;;  %s5079_s3 = inlined_call_operand.vmem [shape: f32[64,1], index: 3, kind: input, shape index: {}]   ;;  %s5080_s4 = inlined_call_operand.vmem [shape: f32[64,576], index: 4, kind: input, shape index: {}]   ;;  %s5081_s5 = inlined_call_operand.vmem [shape: f32[64,1], index: 5, kind: input, shape index: {}]   ;;  %s5082_s6 = inlined_call_operand.vmem [shape: f32[2,64,256], index: 6, kind: output, shape index: {}]  }
   0x1 LB: > { %s2420_s22 = sadd.s32 4294967295, %s2859_s21   ;;  %p2424_p0 = scmp.ge.s32.totalorder %s2859_s21, 1  ;;  %s2859_s21 = sphi %s2906_s21, %s16_s21  }
   0x2   : > { %p212_p1 = scmp.lt.s32.totalorder %s2859_s21, 3 }
   0x4   : > { %p213_p2 = pnand %p2424_p0, %p212_p1 }
   0x6   : > { %216 = sbr.rel (%p213_p2) target bundleno = 1238 (0x4d6), region = 44 }
   0xd   : > { %p242_p3 = scmp.lt.s32.totalorder %s2420_s22, 1  ;;  %s2861_s27 = smov 17   ;;  %v348_v16 = vlaneseq  ;;  %v268_v20 = vld [vmem:[%s5077_s1] sm:$0x3]  ;;  %v277_v36 = vld [vmem:[%s5078_s2 + $0x8] sm:$0xff]  ;;  %vm974_vm8 = vcmask 523264  }
   0xe   : > { %s2862_s28 = smov 16   ;;  %s2863_s29 = smov 15   ;;  %1063 = vmatprep.mubr.f32.mxu0 %v277_v36  ;;  %v269_v36 = vld [vmem:[%s5077_s1 + $0x2] sm:$0x3] }
   0xf   : > { %s5171_s22 = smov (!%p242_p3, %s2420_s22), 1  ;;  %s2864_s30 = smov 1   ;;  %v369_v17 = vshrl.u32 %v348_v16, 7  ;;  %v3084_v18 = vand.u32 127, %v348_v16 }
  0x10   : > { %s2447_s23 = sshll.u32 %s5171_s22, 7  ;;  %s2865_s11 = smov 127  }
  0x11   : > { %s2922_s26 = scalar_lea.vmem %s5076_s0, %s2447_s23  ;;  %v3086_v19 = vsub.s32 1, %v369_v17  ;;  %v3095_v21 = vsub.s32 0, %v369_v17  ;;  %vm350_vm0 = vcmp.lt.s32.totalorder %v3084_v18, 17  ;;  %vm426_vm1 = vcmp.lt.s32.totalorder %v3084_v18, 16  ;;  %s2866_s14 = smov 113  }
  0x12   : > { %v2925_v0 = vld [vmem:[%s2922_s26 + $0x8] sm:$0xff]  ;;  %v2928_v1 = vld [vmem:[%s2922_s26] sm:$0xff]  ;;  %v2935_v2 = vld [vmem:[%s2922_s26 + $0x18] sm:$0xff]  ;;  %vm502_vm2 = vcmp.lt.s32.totalorder %v3084_v18, 15  ;;  %s2867_s17 = smov 112   ;;  %vm578_vm3 = vcmp.lt.s32.totalorder %v3084_v18, 1  ;;  %s5040_s9 = scalar_lea.vmem %s5082_s6, %s2447_s23 }
  0x13   : > { %332 = vrot.lane.b32.xlu1 %v2925_v0, %s2861_s27  ;;  %316 = vrot.lane.b32.xlu0 %v2928_v1, %s2861_s27  ;;  %v2938_v3 = vld [vmem:[%s2922_s26 + $0x10] sm:$0xff]  ;;  %v2948_v5 = vld [vmem:[%s2922_s26 + $0x20] sm:$0xff]  ;;  %v3099_v24 = vrot.slane %v268_v20, %v3086_v19  ;;  %v3108_v26 = vrot.slane %v268_v20, %v3095_v21  ;;  %s2868_s20 = smov 111   ;;  %vm654_vm4 = vcmp.lt.s32.totalorder %v3084_v18, 127  ;;  %vm730_vm5 = vcmp.lt.s32.totalorder %v3084_v18, 113 }
  0x14   : > { %v2945_v4 = vld [vmem:[%s2922_s26 + $0x30] sm:$0xff]  ;;  %v2955_v6 = vld [vmem:[%s2922_s26 + $0x38] sm:$0xff]  ;;  %v2958_v7 = vld [vmem:[%s2922_s26 + $0x28] sm:$0xff]  ;;  %vm806_vm6 = vcmp.lt.s32.totalorder %v3084_v18, 112  ;;  %vm882_vm7 = vcmp.lt.s32.totalorder %v3084_v18, 111 }
  0x15   : > { %v2965_v8 = vld [vmem:[%s2922_s26 + $0x50] sm:$0xff]  ;;  %v2968_v9 = vld [vmem:[%s2922_s26 + $0x40] sm:$0xff]  ;;  %v2975_v10 = vld [vmem:[%s2922_s26 + $0x58] sm:$0xff] }
  0x16   : > { %v2978_v11 = vld [vmem:[%s2922_s26 + $0x48] sm:$0xff]  ;;  %v2985_v12 = vld [vmem:[%s2922_s26 + $0x70] sm:$0xff]  ;;  %v2988_v13 = vld [vmem:[%s2922_s26 + $0x60] sm:$0xff] }
  0x17   : > { %334 = vrot.lane.b32.xlu1 %v2935_v2, %s2861_s27  ;;  %318 = vrot.lane.b32.xlu0 %v2938_v3, %s2861_s27  ;;  %v2995_v14 = vld [vmem:[%s2922_s26 + $0x78] sm:$0xff]  ;;  %v2998_v15 = vld [vmem:[%s2922_s26 + $0x68] sm:$0xff] }
  0x18   : > { %v1391_v18 = vld [vmem:[%s5080_s4 + $0x128] sm:$0xff] }
  0x1b   : > { %322 = vrot.lane.b32.xlu1 %v2945_v4, %s2861_s27  ;;  %320 = vrot.lane.b32.xlu0 %v2948_v5, %s2861_s27 }
  0x1f   : > { %338 = vrot.lane.b32.xlu1 %v2955_v6, %s2861_s27  ;;  %336 = vrot.lane.b32.xlu0 %v2958_v7, %s2861_s27 }
  0x23   : > { %326 = vrot.lane.b32.xlu1 %v2965_v8, %s2861_s27  ;;  %324 = vrot.lane.b32.xlu0 %v2968_v9, %s2861_s27 }
  0x27   : > { %342 = vrot.lane.b32.xlu1 %v2975_v10, %s2861_s27  ;;  %340 = vrot.lane.b32.xlu0 %v2978_v11, %s2861_s27 }
  0x2b   : > { %330 = vrot.lane.b32.xlu1 %v2985_v12, %s2861_s27  ;;  %328 = vrot.lane.b32.xlu0 %v2988_v13, %s2861_s27 }
  0x2f   : > { %346 = vrot.lane.b32.xlu1 %v2995_v14, %s2861_s27  ;;  %344 = vrot.lane.b32.xlu0 %v2998_v15, %s2861_s27 }
  0x33   : > { %396 = vrot.lane.b32.xlu1 %v2938_v3, %s2862_s28  ;;  %394 = vrot.lane.b32.xlu0 %v2928_v1, %s2862_s28 }
  0x37   : > { %412 = vrot.lane.b32.xlu1 %v2935_v2, %s2862_s28  ;;  %410 = vrot.lane.b32.xlu0 %v2925_v0, %s2862_s28 }
  0x3b   : > { %400 = vrot.lane.b32.xlu1 %v2945_v4, %s2862_s28  ;;  %398 = vrot.lane.b32.xlu0 %v2948_v5, %s2862_s28 }
  0x3f   : > { %416 = vrot.lane.b32.xlu1 %v2955_v6, %s2862_s28  ;;  %414 = vrot.lane.b32.xlu0 %v2958_v7, %s2862_s28 }
  0x43   : > { %404 = vrot.lane.b32.xlu1 %v2965_v8, %s2862_s28  ;;  %402 = vrot.lane.b32.xlu0 %v2968_v9, %s2862_s28 }
  0x47   : > { %420 = vrot.lane.b32.xlu1 %v2975_v10, %s2862_s28  ;;  %418 = vrot.lane.b32.xlu0 %v2978_v11, %s2862_s28 }
  0x4b   : > { %408 = vrot.lane.b32.xlu1 %v2985_v12, %s2862_s28  ;;  %406 = vrot.lane.b32.xlu0 %v2988_v13, %s2862_s28 }
  0x4f   : > { %424 = vrot.lane.b32.xlu1 %v2995_v14, %s2862_s28  ;;  %422 = vrot.lane.b32.xlu0 %v2998_v15, %s2862_s28 }
  0x53   : > { %472 = vrot.lane.b32.xlu1 %v2938_v3, %s2863_s29  ;;  %470 = vrot.lane.b32.xlu0 %v2928_v1, %s2863_s29 }
  0x57   : > { %488 = vrot.lane.b32.xlu1 %v2935_v2, %s2863_s29  ;;  %486 = vrot.lane.b32.xlu0 %v2925_v0, %s2863_s29 }
  0x5b   : > { %476 = vrot.lane.b32.xlu1 %v2945_v4, %s2863_s29  ;;  %474 = vrot.lane.b32.xlu0 %v2948_v5, %s2863_s29 }
  0x5f   : > { %492 = vrot.lane.b32.xlu1 %v2955_v6, %s2863_s29  ;;  %490 = vrot.lane.b32.xlu0 %v2958_v7, %s2863_s29 }
  0x63   : > { %480 = vrot.lane.b32.xlu1 %v2965_v8, %s2863_s29  ;;  %478 = vrot.lane.b32.xlu0 %v2968_v9, %s2863_s29 }
  0x67   : > { %496 = vrot.lane.b32.xlu1 %v2975_v10, %s2863_s29  ;;  %494 = vrot.lane.b32.xlu0 %v2978_v11, %s2863_s29 }
  0x6b   : > { %484 = vrot.lane.b32.xlu1 %v2985_v12, %s2863_s29  ;;  %482 = vrot.lane.b32.xlu0 %v2988_v13, %s2863_s29 }
  0x6f   : > { %500 = vrot.lane.b32.xlu1 %v2995_v14, %s2863_s29  ;;  %498 = vrot.lane.b32.xlu0 %v2998_v15, %s2863_s29 }
  0x73   : > { %548 = vrot.lane.b32.xlu1 %v2938_v3, %s2864_s30  ;;  %546 = vrot.lane.b32.xlu0 %v2928_v1, %s2864_s30 }
  0x77   : > { %564 = vrot.lane.b32.xlu1 %v2935_v2, %s2864_s30  ;;  %562 = vrot.lane.b32.xlu0 %v2925_v0, %s2864_s30 }
  0x7b   : > { %552 = vrot.lane.b32.xlu1 %v2945_v4, %s2864_s30  ;;  %550 = vrot.lane.b32.xlu0 %v2948_v5, %s2864_s30 }
  0x7f   : > { %568 = vrot.lane.b32.xlu1 %v2955_v6, %s2864_s30  ;;  %566 = vrot.lane.b32.xlu0 %v2958_v7, %s2864_s30 }
  0x83   : > { %556 = vrot.lane.b32.xlu1 %v2965_v8, %s2864_s30  ;;  %554 = vrot.lane.b32.xlu0 %v2968_v9, %s2864_s30 }
  0x85   : > { %v333_v22 = vpop.permute.xlu1 %332  ;;  %v317_v23 = vpop.permute.xlu0 %316 }
  0x86   : > { %v351_v25 = vsel %vm350_vm0, %v317_v23, %v333_v22  ;;  %v359_v27 = vsel %vm350_vm0, %v333_v22, %v317_v23 }
  0x87   : > { %572 = vrot.lane.b32.xlu1 %v2975_v10, %s2864_s30  ;;  %570 = vrot.lane.b32.xlu0 %v2978_v11, %s2864_s30  ;;  %v379_v32 = vmul.f32 %v3099_v24, %v351_v25  ;;  %v378_v34 = vmul.f32 %v3108_v26, %v359_v27 }
  0x89   : > { %v335_v28 = vpop.permute.xlu1 %334  ;;  %v319_v29 = vpop.permute.xlu0 %318 }
  0x8a   : > { %v360_v30 = vsel %vm350_vm0, %v335_v28, %v319_v29  ;;  %v352_v31 = vsel %vm350_vm0, %v319_v29, %v335_v28 }
  0x8b   : > { %560 = vrot.lane.b32.xlu1 %v2985_v12, %s2864_s30  ;;  %558 = vrot.lane.b32.xlu0 %v2988_v13, %s2864_s30  ;;  %v381_v33 = vmul.f32 %v3099_v24, %v352_v31  ;;  %v380_v35 = vmul.f32 %v3108_v26, %v360_v30 }
  0x8d   : > { %v323_v37 = vpop.permute.xlu1 %322  ;;  %v321_v38 = vpop.permute.xlu0 %320  ;;  %v2449_v39 = vpack.c.bf16 %v381_v33, %v379_v32  ;;  %v2451_v40 = vpack.c.bf16 %v380_v35, %v378_v34 }
  0x8f   : > { %576 = vrot.lane.b32.xlu1 %v2995_v14, %s2864_s30  ;;  %574 = vrot.lane.b32.xlu0 %v2998_v15, %s2864_s30 }
  0x90   : > { %2450 = vmatprep.subr.bf16.mxu0 %v2449_v39 }
  0x91   : > { %2452 = vmatpush1.bf16.msra.mxu0 %v2451_v40  ;;  %v339_v41 = vpop.permute.xlu1 %338  ;;  %v337_v42 = vpop.permute.xlu0 %336 }
  0x92   : > { %v354_v43 = vsel %vm350_vm0, %v323_v37, %v339_v41  ;;  %v362_v44 = vsel %vm350_vm0, %v339_v41, %v323_v37  ;;  %v353_v45 = vsel %vm350_vm0, %v321_v38, %v337_v42  ;;  %v361_v46 = vsel %vm350_vm0, %v337_v42, %v321_v38 }
  0x93   : > { %v384_v47 = vmul.f32 %v3108_v26, %v362_v44  ;;  %v385_v48 = vmul.f32 %v3099_v24, %v354_v43  ;;  %v382_v49 = vmul.f32 %v3108_v26, %v361_v46  ;;  %v383_v50 = vmul.f32 %v3099_v24, %v353_v45  ;;  %624 = vrot.lane.b32.xlu1 %v2938_v3, %s2865_s11 }
  0x94   : > { %622 = vrot.lane.b32.xlu0 %v2928_v1, %s2865_s11  ;;  %v3194_v41 = vrot.slane %v269_v36, %v3095_v21  ;;  %v3197_v42 = vrot.slane %v269_v36, %v3086_v19 }
  0x95   : > { %v327_v51 = vpop.permute.xlu1 %326  ;;  %v325_v52 = vpop.permute.xlu0 %324  ;;  %v2453_v53 = vpack.c.bf16 %v385_v48, %v383_v50  ;;  %v2455_v54 = vpack.c.bf16 %v384_v47, %v382_v49 }
  0x97   : > { %640 = vrot.lane.b32.xlu1 %v2935_v2, %s2865_s11  ;;  %2454 = vmatprep.subr.bf16.mxu0 %v2453_v53 }
  0x98   : > { %638 = vrot.lane.b32.xlu0 %v2925_v0, %s2865_s11  ;;  %2456 = vmatpush1.bf16.msra.mxu0 %v2455_v54 }
  0x99   : > { %v343_v55 = vpop.permute.xlu1 %342  ;;  %v341_v56 = vpop.permute.xlu0 %340 }
  0x9a   : > { %v356_v57 = vsel %vm350_vm0, %v327_v51, %v343_v55  ;;  %v364_v58 = vsel %vm350_vm0, %v343_v55, %v327_v51  ;;  %v355_v59 = vsel %vm350_vm0, %v325_v52, %v341_v56  ;;  %v363_v60 = vsel %vm350_vm0, %v341_v56, %v325_v52 }
  0x9b   : > { %v388_v61 = vmul.f32 %v3108_v26, %v364_v58  ;;  %v389_v62 = vmul.f32 %v3099_v24, %v356_v57  ;;  %v386_v63 = vmul.f32 %v3108_v26, %v363_v60  ;;  %v387_v16 = vmul.f32 %v3099_v24, %v355_v59  ;;  %628 = vrot.lane.b32.xlu1 %v2945_v4, %s2865_s11 }
  0x9c   : > { %626 = vrot.lane.b32.xlu0 %v2948_v5, %s2865_s11 }
  0x9d   : > { %v331_v17 = vpop.permute.xlu1 %330  ;;  %v329_v20 = vpop.permute.xlu0 %328  ;;  %v2457_v22 = vpack.c.bf16 %v389_v62, %v387_v16  ;;  %v2459_v23 = vpack.c.bf16 %v388_v61, %v386_v63 }
  0x9f   : > { %644 = vrot.lane.b32.xlu1 %v2955_v6, %s2865_s11  ;;  %2458 = vmatprep.subr.bf16.mxu0 %v2457_v22 }
  0xa0   : > { %642 = vrot.lane.b32.xlu0 %v2958_v7, %s2865_s11  ;;  %2460 = vmatpush1.bf16.msra.mxu0 %v2459_v23 }
  0xa1   : > { %v347_v25 = vpop.permute.xlu1 %346  ;;  %v345_v27 = vpop.permute.xlu0 %344 }
  0xa2   : > { %v358_v28 = vsel %vm350_vm0, %v331_v17, %v347_v25  ;;  %v366_v29 = vsel %vm350_vm0, %v347_v25, %v331_v17  ;;  %v357_v30 = vsel %vm350_vm0, %v329_v20, %v345_v27  ;;  %v365_v31 = vsel %vm350_vm0, %v345_v27, %v329_v20 }
  0xa3   : > { %v392_v32 = vmul.f32 %v3108_v26, %v366_v29  ;;  %v393_v33 = vmul.f32 %v3099_v24, %v358_v28  ;;  %v390_v34 = vmul.f32 %v3108_v26, %v365_v31  ;;  %v391_v35 = vmul.f32 %v3099_v24, %v357_v30  ;;  %632 = vrot.lane.b32.xlu1 %v2965_v8, %s2865_s11 }
  0xa4   : > { %630 = vrot.lane.b32.xlu0 %v2968_v9, %s2865_s11 }
  0xa5   : > { %v397_v37 = vpop.permute.xlu1 %396  ;;  %v395_v38 = vpop.permute.xlu0 %394  ;;  %v2461_v39 = vpack.c.bf16 %v393_v33, %v391_v35  ;;  %v2463_v40 = vpack.c.bf16 %v392_v32, %v390_v34 }
  0xa7   : > { %648 = vrot.lane.b32.xlu1 %v2975_v10, %s2865_s11  ;;  %2462 = vmatprep.subr.bf16.mxu0 %v2461_v39 }
  0xa8   : > { %646 = vrot.lane.b32.xlu0 %v2978_v11, %s2865_s11  ;;  %2464 = vmatpush1.bf16.msra.mxu0 %v2463_v40 }
  0xa9   : > { %v413_v43 = vpop.permute.xlu1 %412  ;;  %v411_v44 = vpop.permute.xlu0 %410 }
  0xaa   : > { %v428_v45 = vsel %vm426_vm1, %v397_v37, %v413_v43  ;;  %v436_v46 = vsel %vm426_vm1, %v413_v43, %v397_v37  ;;  %v427_v47 = vsel %vm426_vm1, %v395_v38, %v411_v44  ;;  %v435_v48 = vsel %vm426_vm1, %v411_v44, %v395_v38 }
  0xab   : > { %v456_v49 = vmul.f32 %v3194_v41, %v436_v46  ;;  %v457_v50 = vmul.f32 %v3197_v42, %v428_v45  ;;  %v454_v51 = vmul.f32 %v3194_v41, %v435_v48  ;;  %v455_v52 = vmul.f32 %v3197_v42, %v427_v47  ;;  %636 = vrot.lane.b32.xlu1 %v2985_v12, %s2865_s11 }
  0xac   : > { %634 = vrot.lane.b32.xlu0 %v2988_v13, %s2865_s11 }
  0xad   : > { %v401_v53 = vpop.permute.xlu1 %400  ;;  %v399_v54 = vpop.permute.xlu0 %398  ;;  %v2465_v55 = vpack.c.bf16 %v457_v50, %v455_v52  ;;  %v2467_v56 = vpack.c.bf16 %v456_v49, %v454_v51 }
  0xaf   : > { %652 = vrot.lane.b32.xlu1 %v2995_v14, %s2865_s11  ;;  %2466 = vmatprep.subr.bf16.mxu0 %v2465_v55 }
  0xb0   : > { %650 = vrot.lane.b32.xlu0 %v2998_v15, %s2865_s11  ;;  %2468 = vmatpush1.bf16.msra.mxu0 %v2467_v56 }
  0xb1   : > { %v417_v57 = vpop.permute.xlu1 %416  ;;  %v415_v58 = vpop.permute.xlu0 %414 }
  0xb2   : > { %v430_v59 = vsel %vm426_vm1, %v401_v53, %v417_v57  ;;  %v438_v60 = vsel %vm426_vm1, %v417_v57, %v401_v53  ;;  %v429_v61 = vsel %vm426_vm1, %v399_v54, %v415_v58  ;;  %v437_v62 = vsel %vm426_vm1, %v415_v58, %v399_v54  ;;  %v270_v54 = vld [vmem:[%s5077_s1 + $0x4] sm:$0x3] }
  0xb3   : > { %v460_v63 = vmul.f32 %v3194_v41, %v438_v60  ;;  %v461_v16 = vmul.f32 %v3197_v42, %v430_v59  ;;  %v458_v17 = vmul.f32 %v3194_v41, %v437_v62  ;;  %v459_v20 = vmul.f32 %v3197_v42, %v429_v61  ;;  %700 = vrot.lane.b32.xlu1 %v2938_v3, %s2866_s14 }
  0xb4   : > { %698 = vrot.lane.b32.xlu0 %v2928_v1, %s2866_s14  ;;  %v3284_v59 = vrot.slane %v270_v54, %v3095_v21  ;;  %v3287_v60 = vrot.slane %v270_v54, %v3086_v19 }
  0xb5   : > { %v405_v22 = vpop.permute.xlu1 %404  ;;  %v403_v23 = vpop.permute.xlu0 %402  ;;  %v2469_v25 = vpack.c.bf16 %v461_v16, %v459_v20  ;;  %v2471_v27 = vpack.c.bf16 %v460_v63, %v458_v17 }
  0xb7   : > { %716 = vrot.lane.b32.xlu1 %v2935_v2, %s2866_s14  ;;  %2470 = vmatprep.subr.bf16.mxu0 %v2469_v25 }
  0xb8   : > { %714 = vrot.lane.b32.xlu0 %v2925_v0, %s2866_s14  ;;  %2472 = vmatpush1.bf16.msra.mxu0 %v2471_v27 }
  0xb9   : > { %v421_v28 = vpop.permute.xlu1 %420  ;;  %v419_v29 = vpop.permute.xlu0 %418 }
  0xba   : > { %v432_v30 = vsel %vm426_vm1, %v405_v22, %v421_v28  ;;  %v440_v31 = vsel %vm426_vm1, %v421_v28, %v405_v22  ;;  %v431_v32 = vsel %vm426_vm1, %v403_v23, %v419_v29  ;;  %v439_v33 = vsel %vm426_vm1, %v419_v29, %v403_v23 }
  0xbb   : > { %v464_v34 = vmul.f32 %v3194_v41, %v440_v31  ;;  %v465_v35 = vmul.f32 %v3197_v42, %v432_v30  ;;  %v462_v36 = vmul.f32 %v3194_v41, %v439_v33  ;;  %v463_v37 = vmul.f32 %v3197_v42, %v431_v32  ;;  %704 = vrot.lane.b32.xlu1 %v2945_v4, %s2866_s14 }
  0xbc   : > { %702 = vrot.lane.b32.xlu0 %v2948_v5, %s2866_s14 }
  0xbd   : > { %v409_v38 = vpop.permute.xlu1 %408  ;;  %v407_v39 = vpop.permute.xlu0 %406  ;;  %v2473_v40 = vpack.c.bf16 %v465_v35, %v463_v37  ;;  %v2475_v43 = vpack.c.bf16 %v464_v34, %v462_v36 }
  0xbf   : > { %720 = vrot.lane.b32.xlu1 %v2955_v6, %s2866_s14  ;;  %2474 = vmatprep.subr.bf16.mxu0 %v2473_v40 }
  0xc0   : > { %718 = vrot.lane.b32.xlu0 %v2958_v7, %s2866_s14  ;;  %2476 = vmatpush1.bf16.msra.mxu0 %v2475_v43 }
  0xc1   : > { %v425_v44 = vpop.permute.xlu1 %424  ;;  %v423_v45 = vpop.permute.xlu0 %422 }
  0xc2   : > { %v434_v46 = vsel %vm426_vm1, %v409_v38, %v425_v44  ;;  %v442_v47 = vsel %vm426_vm1, %v425_v44, %v409_v38  ;;  %v433_v48 = vsel %vm426_vm1, %v407_v39, %v423_v45  ;;  %v441_v49 = vsel %vm426_vm1, %v423_v45, %v407_v39 }
  0xc3   : > { %v468_v50 = vmul.f32 %v3194_v41, %v442_v47  ;;  %v469_v51 = vmul.f32 %v3197_v42, %v434_v46  ;;  %v466_v52 = vmul.f32 %v3194_v41, %v441_v49  ;;  %v467_v53 = vmul.f32 %v3197_v42, %v433_v48  ;;  %708 = vrot.lane.b32.xlu1 %v2965_v8, %s2866_s14 }
  0xc4   : > { %706 = vrot.lane.b32.xlu0 %v2968_v9, %s2866_s14 }
  0xc5   : > { %v473_v55 = vpop.permute.xlu1 %472  ;;  %v471_v56 = vpop.permute.xlu0 %470  ;;  %v2477_v57 = vpack.c.bf16 %v469_v51, %v467_v53  ;;  %v2479_v58 = vpack.c.bf16 %v468_v50, %v466_v52 }
  0xc7   : > { %724 = vrot.lane.b32.xlu1 %v2975_v10, %s2866_s14  ;;  %2478 = vmatprep.subr.bf16.mxu0 %v2477_v57 }
  0xc8   : > { %722 = vrot.lane.b32.xlu0 %v2978_v11, %s2866_s14  ;;  %2480 = vmatpush1.bf16.msra.mxu0 %v2479_v58 }
  0xc9   : > { %v489_v61 = vpop.permute.xlu1 %488  ;;  %v487_v62 = vpop.permute.xlu0 %486 }
  0xca   : > { %v504_v63 = vsel %vm502_vm2, %v473_v55, %v489_v61  ;;  %v512_v16 = vsel %vm502_vm2, %v489_v61, %v473_v55  ;;  %v503_v17 = vsel %vm502_vm2, %v471_v56, %v487_v62  ;;  %v511_v20 = vsel %vm502_vm2, %v487_v62, %v471_v56 }
  0xcb   : > { %v532_v22 = vmul.f32 %v3284_v59, %v512_v16  ;;  %v533_v23 = vmul.f32 %v3287_v60, %v504_v63  ;;  %v530_v25 = vmul.f32 %v3284_v59, %v511_v20  ;;  %v531_v27 = vmul.f32 %v3287_v60, %v503_v17  ;;  %712 = vrot.lane.b32.xlu1 %v2985_v12, %s2866_s14 }
  0xcc   : > { %710 = vrot.lane.b32.xlu0 %v2988_v13, %s2866_s14 }
  0xcd   : > { %v477_v28 = vpop.permute.xlu1 %476  ;;  %v475_v29 = vpop.permute.xlu0 %474  ;;  %v2481_v30 = vpack.c.bf16 %v533_v23, %v531_v27  ;;  %v2483_v31 = vpack.c.bf16 %v532_v22, %v530_v25 }
  0xcf   : > { %728 = vrot.lane.b32.xlu1 %v2995_v14, %s2866_s14  ;;  %2482 = vmatprep.subr.bf16.mxu0 %v2481_v30 }
  0xd0   : > { %726 = vrot.lane.b32.xlu0 %v2998_v15, %s2866_s14  ;;  %2484 = vmatpush1.bf16.msra.mxu0 %v2483_v31  ;;  %v271_v31 = vld [vmem:[%s5077_s1 + $0x6] sm:$0x3] }
  0xd1   : > { %v493_v32 = vpop.permute.xlu1 %492  ;;  %v491_v33 = vpop.permute.xlu0 %490 }
  0xd2   : > { %v506_v34 = vsel %vm502_vm2, %v477_v28, %v493_v32  ;;  %v514_v35 = vsel %vm502_vm2, %v493_v32, %v477_v28  ;;  %v505_v36 = vsel %vm502_vm2, %v475_v29, %v491_v33  ;;  %v513_v37 = vsel %vm502_vm2, %v491_v33, %v475_v29 }
  0xd3   : > { %v536_v38 = vmul.f32 %v3284_v59, %v514_v35  ;;  %v537_v39 = vmul.f32 %v3287_v60, %v506_v34  ;;  %v534_v40 = vmul.f32 %v3284_v59, %v513_v37  ;;  %v535_v43 = vmul.f32 %v3287_v60, %v505_v36  ;;  %776 = vrot.lane.b32.xlu1 %v2938_v3, %s2867_s17 }
  0xd4   : > { %774 = vrot.lane.b32.xlu0 %v2928_v1, %s2867_s17  ;;  %v3374_v36 = vrot.slane %v271_v31, %v3095_v21  ;;  %v3377_v37 = vrot.slane %v271_v31, %v3086_v19 }
  0xd5   : > { %v481_v44 = vpop.permute.xlu1 %480  ;;  %v479_v45 = vpop.permute.xlu0 %478  ;;  %v2485_v46 = vpack.c.bf16 %v537_v39, %v535_v43  ;;  %v2487_v47 = vpack.c.bf16 %v536_v38, %v534_v40 }
  0xd6   : > { %5119 = vst [vmem:[#allocation2_spill] sm:$0xff] %v3374_v36  ;;  %5120 = vst [vmem:[#allocation3_spill] sm:$0xff] %v3377_v37 }
  0xd7   : > { %792 = vrot.lane.b32.xlu1 %v2935_v2, %s2867_s17  ;;  %2486 = vmatprep.subr.bf16.mxu0 %v2485_v46 }
  0xd8   : > { %790 = vrot.lane.b32.xlu0 %v2925_v0, %s2867_s17  ;;  %2488 = vmatpush1.bf16.msra.mxu0 %v2487_v47 }
  0xd9   : > { %v497_v48 = vpop.permute.xlu1 %496  ;;  %v495_v49 = vpop.permute.xlu0 %494 }
  0xda   : > { %v508_v50 = vsel %vm502_vm2, %v481_v44, %v497_v48  ;;  %v516_v51 = vsel %vm502_vm2, %v497_v48, %v481_v44  ;;  %v507_v52 = vsel %vm502_vm2, %v479_v45, %v495_v49  ;;  %v515_v53 = vsel %vm502_vm2, %v495_v49, %v479_v45 }
  0xdb   : > { %v540_v54 = vmul.f32 %v3284_v59, %v516_v51  ;;  %v541_v55 = vmul.f32 %v3287_v60, %v508_v50  ;;  %v538_v56 = vmul.f32 %v3284_v59, %v515_v53  ;;  %v539_v57 = vmul.f32 %v3287_v60, %v507_v52  ;;  %780 = vrot.lane.b32.xlu1 %v2945_v4, %s2867_s17 }
  0xdc   : > { %778 = vrot.lane.b32.xlu0 %v2948_v5, %s2867_s17 }
  0xdd   : > { %v485_v58 = vpop.permute.xlu1 %484  ;;  %v483_v61 = vpop.permute.xlu0 %482  ;;  %v2489_v62 = vpack.c.bf16 %v541_v55, %v539_v57  ;;  %v2491_v63 = vpack.c.bf16 %v540_v54, %v538_v56 }
  0xdf   : > { %796 = vrot.lane.b32.xlu1 %v2955_v6, %s2867_s17  ;;  %2490 = vmatprep.subr.bf16.mxu0 %v2489_v62 }
  0xe0   : > { %794 = vrot.lane.b32.xlu0 %v2958_v7, %s2867_s17  ;;  %2492 = vmatpush1.bf16.msra.mxu0 %v2491_v63 }
  0xe1   : > { %v501_v16 = vpop.permute.xlu1 %500  ;;  %v499_v17 = vpop.permute.xlu0 %498 }
  0xe2   : > { %v510_v20 = vsel %vm502_vm2, %v485_v58, %v501_v16  ;;  %v518_v22 = vsel %vm502_vm2, %v501_v16, %v485_v58  ;;  %v509_v23 = vsel %vm502_vm2, %v483_v61, %v499_v17  ;;  %v517_v25 = vsel %vm502_vm2, %v499_v17, %v483_v61 }
  0xe3   : > { %v544_v27 = vmul.f32 %v3284_v59, %v518_v22  ;;  %v545_v28 = vmul.f32 %v3287_v60, %v510_v20  ;;  %v542_v29 = vmul.f32 %v3284_v59, %v517_v25  ;;  %v543_v30 = vmul.f32 %v3287_v60, %v509_v23  ;;  %784 = vrot.lane.b32.xlu1 %v2965_v8, %s2867_s17 }
  0xe4   : > { %782 = vrot.lane.b32.xlu0 %v2968_v9, %s2867_s17 }
  0xe5   : > { %v549_v32 = vpop.permute.xlu1 %548  ;;  %v547_v33 = vpop.permute.xlu0 %546  ;;  %v2493_v34 = vpack.c.bf16 %v545_v28, %v543_v30  ;;  %v2495_v35 = vpack.c.bf16 %v544_v27, %v542_v29 }
  0xe7   : > { %800 = vrot.lane.b32.xlu1 %v2975_v10, %s2867_s17  ;;  %2494 = vmatprep.subr.bf16.mxu0 %v2493_v34 }
  0xe8   : > { %798 = vrot.lane.b32.xlu0 %v2978_v11, %s2867_s17  ;;  %2496 = vmatpush1.bf16.msra.mxu0 %v2495_v35 }
  0xe9   : > { %v565_v38 = vpop.permute.xlu1 %564  ;;  %v563_v39 = vpop.permute.xlu0 %562 }
  0xea   : > { %v580_v40 = vsel %vm578_vm3, %v549_v32, %v565_v38  ;;  %v588_v43 = vsel %vm578_vm3, %v565_v38, %v549_v32  ;;  %v579_v44 = vsel %vm578_vm3, %v547_v33, %v563_v39  ;;  %v587_v45 = vsel %vm578_vm3, %v563_v39, %v547_v33 }
  0xeb   : > { %v608_v46 = vmul.f32 %v3374_v36, %v588_v43  ;;  %v609_v47 = vmul.f32 %v3377_v37, %v580_v40  ;;  %v606_v48 = vmul.f32 %v3374_v36, %v587_v45  ;;  %v607_v49 = vmul.f32 %v3377_v37, %v579_v44  ;;  %788 = vrot.lane.b32.xlu1 %v2985_v12, %s2867_s17 }
  0xec   : > { %786 = vrot.lane.b32.xlu0 %v2988_v13, %s2867_s17 }
  0xed   : > { %v553_v50 = vpop.permute.xlu1 %552  ;;  %v551_v51 = vpop.permute.xlu0 %550  ;;  %v2497_v52 = vpack.c.bf16 %v609_v47, %v607_v49  ;;  %v2499_v53 = vpack.c.bf16 %v608_v46, %v606_v48 }
  0xef   : > { %804 = vrot.lane.b32.xlu1 %v2995_v14, %s2867_s17  ;;  %2498 = vmatprep.subr.bf16.mxu0 %v2497_v52 }
  0xf0   : > { %802 = vrot.lane.b32.xlu0 %v2998_v15, %s2867_s17  ;;  %2500 = vmatpush1.bf16.msra.mxu0 %v2499_v53 }
  0xf1   : > { %v569_v54 = vpop.permute.xlu1 %568  ;;  %v567_v55 = vpop.permute.xlu0 %566 }
  0xf2   : > { %v582_v56 = vsel %vm578_vm3, %v553_v50, %v569_v54  ;;  %v590_v57 = vsel %vm578_vm3, %v569_v54, %v553_v50  ;;  %v581_v58 = vsel %vm578_vm3, %v551_v51, %v567_v55  ;;  %v589_v61 = vsel %vm578_vm3, %v567_v55, %v551_v51 }
  0xf3   : > { %v612_v62 = vmul.f32 %v3374_v36, %v590_v57  ;;  %v613_v63 = vmul.f32 %v3377_v37, %v582_v56  ;;  %v610_v16 = vmul.f32 %v3374_v36, %v589_v61  ;;  %v611_v17 = vmul.f32 %v3377_v37, %v581_v58  ;;  %852 = vrot.lane.b32.xlu1 %v2938_v3, %s2868_s20 }
  0xf4   : > { %850 = vrot.lane.b32.xlu0 %v2928_v1, %s2868_s20  ;;  %v2513_v58 = vpack.c.bf16 %v2935_v2, %v2925_v0 }
  0xf5   : > { %v557_v20 = vpop.permute.xlu1 %556  ;;  %v555_v22 = vpop.permute.xlu0 %554  ;;  %v2501_v23 = vpack.c.bf16 %v613_v63, %v611_v17  ;;  %v2503_v25 = vpack.c.bf16 %v612_v62, %v610_v16  ;;  %v276_v63 = vld [vmem:[%s5078_s2] sm:$0xff]  ;;  %v2515_v16 = vpack.c.bf16 %v2938_v3, %v2928_v1  ;;  %v2519_v3 = vpack.c.bf16 %v2945_v4, %v2948_v5 }
  0xf7   : > { %868 = vrot.lane.b32.xlu1 %v2935_v2, %s2868_s20  ;;  %2502 = vmatprep.subr.bf16.mxu0 %v2501_v23  ;;  %v282_v2 = vld [vmem:[%s5078_s2 + $0x30] sm:$0xff]  ;;  %v287_v23 = vld [vmem:[%s5078_s2 + $0x58] sm:$0xff] }
  0xf8   : > { %866 = vrot.lane.b32.xlu0 %v2925_v0, %s2868_s20  ;;  %2504 = vmatpush1.bf16.msra.mxu0 %v2503_v25  ;;  %v2517_v0 = vpack.c.bf16 %v2955_v6, %v2958_v7  ;;  %v2523_v25 = vpack.c.bf16 %v2965_v8, %v2968_v9 }
  0xf9   : > { %v573_v27 = vpop.permute.xlu1 %572  ;;  %v571_v28 = vpop.permute.xlu0 %570 }
  0xfa   : > { %v584_v29 = vsel %vm578_vm3, %v557_v20, %v573_v27  ;;  %v592_v30 = vsel %vm578_vm3, %v573_v27, %v557_v20  ;;  %v583_v31 = vsel %vm578_vm3, %v555_v22, %v571_v28  ;;  %v591_v32 = vsel %vm578_vm3, %v571_v28, %v555_v22  ;;  %v272_v20 = vld [vmem:[%s5077_s1 + $0xa] sm:$0x3]  ;;  %v286_v27 = vld [vmem:[%s5078_s2 + $0x50] sm:$0xff] }
  0xfb   : > { %v616_v33 = vmul.f32 %v3374_v36, %v592_v30  ;;  %v617_v34 = vmul.f32 %v3377_v37, %v584_v29  ;;  %v614_v35 = vmul.f32 %v3374_v36, %v591_v32  ;;  %v615_v38 = vmul.f32 %v3377_v37, %v583_v31  ;;  %856 = vrot.lane.b32.xlu1 %v2945_v4, %s2868_s20  ;;  %v292_v31 = vld [vmem:[%s5078_s2 + $0x80] sm:$0xff] }
  0xfc   : > { %854 = vrot.lane.b32.xlu0 %v2948_v5, %s2868_s20  ;;  %v2521_v22 = vpack.c.bf16 %v2975_v10, %v2978_v11  ;;  %v3494_v4 = vrot.slane %v272_v20, %v3086_v19  ;;  %v3508_v28 = vrot.slane %v272_v20, %v3095_v21  ;;  %v2525_v30 = vpack.c.bf16 %v2995_v14, %v2998_v15 }
  0xfd   : > { %v561_v39 = vpop.permute.xlu1 %560  ;;  %v559_v40 = vpop.permute.xlu0 %558  ;;  %v2505_v43 = vpack.c.bf16 %v617_v34, %v615_v38  ;;  %v2507_v44 = vpack.c.bf16 %v616_v33, %v614_v35  ;;  %v2527_v35 = vpack.c.bf16 %v2985_v12, %v2988_v13  ;;  %v291_v38 = vld [vmem:[%s5078_s2 + $0x78] sm:$0xff] }
  0xfe   : > { %5121 = vst [vmem:[#allocation4_spill] sm:$0xff] %v3494_v4  ;;  %5122 = vst [vmem:[#allocation5_spill] sm:$0xff] %v3508_v28 }
  0xff   : > { %872 = vrot.lane.b32.xlu1 %v2955_v6, %s2868_s20  ;;  %2506 = vmatprep.subr.bf16.mxu0 %v2505_v43  ;;  %v281_v6 = vld [vmem:[%s5078_s2 + $0x28] sm:$0xff] }
 0x100   : > { %870 = vrot.lane.b32.xlu0 %v2958_v7, %s2868_s20  ;;  %2508 = vmatpush1.bf16.msra.mxu0 %v2507_v44  ;;  %v297_v44 = vld [vmem:[%s5078_s2 + $0xa8] sm:$0xff] }
 0x101   : > { %v577_v45 = vpop.permute.xlu1 %576  ;;  %v575_v46 = vpop.permute.xlu0 %574 }
 0x102   : > { %v586_v47 = vsel %vm578_vm3, %v561_v39, %v577_v45  ;;  %v594_v48 = vsel %vm578_vm3, %v577_v45, %v561_v39  ;;  %v585_v49 = vsel %vm578_vm3, %v559_v40, %v575_v46  ;;  %v593_v50 = vsel %vm578_vm3, %v575_v46, %v559_v40 }
 0x103   : > { %v620_v51 = vmul.f32 %v3374_v36, %v594_v48  ;;  %v621_v52 = vmul.f32 %v3377_v37, %v586_v47  ;;  %v618_v53 = vmul.f32 %v3374_v36, %v593_v50  ;;  %v619_v54 = vmul.f32 %v3377_v37, %v585_v49  ;;  %860 = vrot.lane.b32.xlu1 %v2965_v8, %s2868_s20  ;;  %v296_v49 = vld [vmem:[%s5078_s2 + $0xa0] sm:$0xff] }
 0x104   : > { %858 = vrot.lane.b32.xlu0 %v2968_v9, %s2868_s20 }
 0x105   : > { %v625_v55 = vpop.permute.xlu1 %624  ;;  %v2509_v56 = vpack.c.bf16 %v621_v52, %v619_v54  ;;  %v2511_v57 = vpack.c.bf16 %v620_v51, %v618_v53  ;;  %v302_v54 = vld [vmem:[%s5078_s2 + $0xd0] sm:$0xff] }
 0x106   : > { %v623_v61 = vpop.permute.xlu0 %622 }
 0x107   : > { %876 = vrot.lane.b32.xlu1 %v2975_v10, %s2868_s20  ;;  %2510 = vmatprep.subr.bf16.mxu0 %v2509_v56 }
 0x108   : > { %874 = vrot.lane.b32.xlu0 %v2978_v11, %s2868_s20  ;;  %2512 = vmatpush1.bf16.msra.mxu0 %v2511_v57 }
 0x109   : > { %v641_v62 = vpop.permute.xlu1 %640  ;;  %2514 = vmatprep.subr.bf16.mxu0 %v2513_v58 }
 0x10a   : > { %v639_v17 = vpop.permute.xlu0 %638  ;;  %v664_v5 = vsel %vm654_vm4, %v641_v62, %v625_v55  ;;  %v656_v8 = vsel %vm654_vm4, %v625_v55, %v641_v62 }
 0x10b   : > { %864 = vrot.lane.b32.xlu1 %v2985_v12, %s2868_s20  ;;  %1064 = vmatmul.mubr.f32.vlgmr.msra.gmra.mrb[0].mxu0 %v276_v63  ;;  %v663_v10 = vsel %vm654_vm4, %v639_v17, %v623_v61  ;;  %v655_v9 = vsel %vm654_vm4, %v623_v61, %v639_v17  ;;  %v685_v32 = vmul.f32 %v3494_v4, %v664_v5  ;;  %v301_v17 = vld [vmem:[%s5078_s2 + $0xc8] sm:$0xff] }
 0x10c   : > { %862 = vrot.lane.b32.xlu0 %v2988_v13, %s2868_s20  ;;  %2516 = vmatpush1.bf16.msra.mxu0 %v2515_v16  ;;  %v683_v33 = vmul.f32 %v3494_v4, %v663_v10  ;;  %v684_v39 = vmul.f32 %v3508_v28, %v656_v8  ;;  %v682_v40 = vmul.f32 %v3508_v28, %v655_v9 }
 0x10d   : > { %v629_v1 = vpop.permute.xlu1 %628  ;;  %1069 = vmatprep.mubr.f32.mxu0 %v282_v2  ;;  %2518 = vmatprep.subr.bf16.mxu0 %v2517_v0 }
 0x10e   : > { %v627_v7 = vpop.permute.xlu0 %626  ;;  %v2529_v47 = vpack.c.bf16 %v685_v32, %v683_v33  ;;  %v2531_v50 = vpack.c.bf16 %v684_v39, %v682_v40  ;;  %v273_v32 = vld [vmem:[%s5077_s1 + $0xc] sm:$0x3] }
 0x10f   : > { %880 = vrot.lane.b32.xlu1 %v2995_v14, %s2868_s20  ;;  %1070 = vmatmul.mubr.f32.gmra.mrb[2].mxu0 %v281_v6  ;;  %v3596_v39 = vrot.slane %v273_v32, %v3095_v21  ;;  %v3599_v40 = vrot.slane %v273_v32, %v3086_v19 }
 0x110   : > { %878 = vrot.lane.b32.xlu0 %v2998_v15, %s2868_s20  ;;  %2520 = vmatpush1.bf16.msra.mxu0 %v2519_v3 }
 0x111   : > { %v645_v11 = vpop.permute.xlu1 %644  ;;  %1075 = vmatprep.mubr.f32.mxu0 %v287_v23  ;;  %2522 = vmatprep.subr.bf16.mxu0 %v2521_v22  ;;  %v306_v22 = vld [vmem:[%s5078_s2 + $0xf0] sm:$0xff]  ;;  %5123 = vst [vmem:[#allocation6_spill] sm:$0xff] %v3596_v39  ;;  %5124 = vst [vmem:[#allocation7_spill] sm:$0xff] %v3599_v40 }
 0x112   : > { %v643_v29 = vpop.permute.xlu0 %642  ;;  %v666_v34 = vsel %vm654_vm4, %v645_v11, %v629_v1  ;;  %v658_v45 = vsel %vm654_vm4, %v629_v1, %v645_v11  ;;  %v307_v1 = vld [vmem:[%s5078_s2 + $0xf8] sm:$0xff] }
 0x113   : > { %1076 = vmatmul.mubr.f32.gmra.mrb[4].mxu0 %v286_v27  ;;  %v665_v14 = vsel %vm654_vm4, %v643_v29, %v627_v7  ;;  %v689_v12 = vmul.f32 %v3494_v4, %v666_v34  ;;  %v657_v13 = vsel %vm654_vm4, %v627_v7, %v643_v29  ;;  %v688_v51 = vmul.f32 %v3508_v28, %v658_v45  ;;  %v311_v34 = vld [vmem:[%s5078_s2 + $0x118] sm:$0xff]  ;;  %v926_v45 = vld [vmem:[%s5079_s3] sm:$0xff] }
 0x114   : > { %2524 = vmatpush1.bf16.msra.mxu0 %v2523_v25  ;;  %1081 = vmatprep.mubr.f32.mxu0 %v292_v31  ;;  %v687_v46 = vmul.f32 %v3494_v4, %v665_v14  ;;  %v686_v55 = vmul.f32 %v3508_v28, %v657_v13  ;;  %v312_v25 = vld [vmem:[%s5078_s2 + $0x120] sm:$0xff] }
 0x115   : > { %v633_v15 = vpop.permute.xlu1 %632  ;;  %2526 = vmatprep.subr.bf16.mxu0 %v2525_v30 }
 0x116   : > { %v631_v43 = vpop.permute.xlu0 %630  ;;  %v2533_v63 = vpack.c.bf16 %v689_v12, %v687_v46  ;;  %v2535_v3 = vpack.c.bf16 %v688_v51, %v686_v55 }
 0x117   : > { %1082 = vmatmul.mubr.f32.gmra.mrb[6].mxu0 %v291_v38  ;;  %v279_v38 = vld [vmem:[%s5078_s2 + $0x18] sm:$0xff] }
 0x118   : > { %2528 = vmatpush1.bf16.msra.mxu0 %v2527_v35  ;;  %1087 = vmatprep.mubr.f32.mxu0 %v297_v44 }
 0x119   : > { %v649_v48 = vpop.permute.xlu1 %648  ;;  %2530 = vmatprep.subr.bf16.mxu0 %v2529_v47  ;;  %v2869_v47 = vmov 0  }
 0x11a   : > { %v668_v52 = vsel %vm654_vm4, %v649_v48, %v633_v15  ;;  %v647_v53 = vpop.permute.xlu0 %646  ;;  %v660_v56 = vsel %vm654_vm4, %v633_v15, %v649_v48  ;;  %2836 = vset.pattern.permute.xlu1 %v2869_v47  ;;  %2835 = vset.pattern.permute.xlu0 %v2869_v47 }
 0x11b   : > { %v659_v57 = vsel %vm654_vm4, %v631_v43, %v647_v53  ;;  %v667_v58 = vsel %vm654_vm4, %v647_v53, %v631_v43  ;;  %v693_v61 = vmul.f32 %v3494_v4, %v668_v52  ;;  %1088 = vmatmul.mubr.f32.gmra.mrb[8].mxu0 %v296_v49  ;;  %v692_v0 = vmul.f32 %v3508_v28, %v660_v56  ;;  %v927_v43 = vld [vmem:[%s5079_s3 + $0x8] sm:$0xff]  ;;  %v929_v56 = vld [vmem:[%s5079_s3 + $0x18] sm:$0xff] }
 0x11c   : > { %v691_v62 = vmul.f32 %v3494_v4, %v667_v58  ;;  %2532 = vmatpush1.bf16.msra.mxu0 %v2531_v50  ;;  %1093 = vmatprep.mubr.f32.mxu0 %v302_v54  ;;  %v690_v2 = vmul.f32 %v3508_v28, %v659_v57  ;;  %v928_v54 = vld [vmem:[%s5079_s3 + $0x10] sm:$0xff] }
 0x11d   : > { %v637_v16 = vpop.permute.xlu1 %636  ;;  %2534 = vmatprep.subr.bf16.mxu0 %v2533_v63  ;;  %941 = vperm.xlu1 %2836, %v927_v43  }
 0x11e   : > { %v635_v20 = vpop.permute.xlu0 %634  ;;  %v2537_v6 = vpack.c.bf16 %v693_v61, %v691_v62  ;;  %v2539_v23 = vpack.c.bf16 %v692_v0, %v690_v2  ;;  %936 = vperm.xlu0 %2835, %v926_v45   ;;  %v930_v62 = vld [vmem:[%s5079_s3 + $0x20] sm:$0xff] }
 0x11f   : > { %1094 = vmatmul.mubr.f32.gmra.mrb[10].mxu0 %v301_v17 }
 0x120   : > { %2536 = vmatpush1.bf16.msra.mxu0 %v2535_v3  ;;  %1099 = vmatprep.mubr.f32.mxu0 %v307_v1 }
 0x121   : > { %v653_v7 = vpop.permute.xlu1 %652  ;;  %2538 = vmatprep.subr.bf16.mxu0 %v2537_v6  ;;  %946 = vperm.xlu1 %2836, %v928_v54  }
 0x122   : > { %v662_v5 = vsel %vm654_vm4, %v637_v16, %v653_v7  ;;  %v670_v10 = vsel %vm654_vm4, %v653_v7, %v637_v16  ;;  %v651_v11 = vpop.permute.xlu0 %650  ;;  %951 = vperm.xlu0 %2835, %v929_v56   ;;  %v931_v16 = vld [vmem:[%s5079_s3 + $0x28] sm:$0xff] }
 0x123   : > { %v696_v27 = vmul.f32 %v3508_v28, %v662_v5  ;;  %v697_v29 = vmul.f32 %v3494_v4, %v670_v10  ;;  %v661_v30 = vsel %vm654_vm4, %v635_v20, %v651_v11  ;;  %v669_v31 = vsel %vm654_vm4, %v651_v11, %v635_v20  ;;  %1100 = vmatmul.mubr.f32.gmra.mrb[12].mxu0 %v306_v22  ;;  %v933_v10 = vld [vmem:[%s5079_s3 + $0x38] sm:$0xff] }
 0x124   : > { %v694_v8 = vmul.f32 %v3508_v28, %v661_v30  ;;  %v695_v9 = vmul.f32 %v3494_v4, %v669_v31  ;;  %2540 = vmatpush1.bf16.msra.mxu0 %v2539_v23  ;;  %1105 = vmatprep.mubr.f32.mxu0 %v312_v25  ;;  %v932_v23 = vld [vmem:[%s5079_s3 + $0x30] sm:$0xff] }
 0x125   : > { %v701_v33 = vpop.permute.xlu1 %700  ;;  %956 = vperm.xlu1 %2836, %v930_v62  }
 0x126   : > { %v2543_v14 = vpack.c.bf16 %v696_v27, %v694_v8  ;;  %v699_v15 = vpop.permute.xlu0 %698  ;;  %v2541_v35 = vpack.c.bf16 %v697_v29, %v695_v9  ;;  %961 = vperm.xlu0 %2835, %v931_v16  }
 0x127   : > { %1106 = vmatmul.mubr.f32.gmra.mrb[14].mxu0 %v311_v34 }
 0x128   : > { %2542 = vmatprep.subr.bf16.mxu0 %v2541_v35  ;;  %1176 = vmatprep.mubr.f32.mxu0 %v279_v38 }
 0x129   : > { %2544 = vmatpush1.bf16.msra.mxu0 %v2543_v14  ;;  %v717_v44 = vpop.permute.xlu1 %716  ;;  %966 = vperm.xlu1 %2836, %v932_v23  }
 0x12a   : > { %v732_v12 = vsel %vm730_vm5, %v701_v33, %v717_v44  ;;  %v740_v13 = vsel %vm730_vm5, %v717_v44, %v701_v33  ;;  %v715_v46 = vpop.permute.xlu0 %714  ;;  %971 = vperm.xlu0 %2835, %v933_v10  }
 0x12b   : > { %v760_v48 = vmul.f32 %v3596_v39, %v732_v12  ;;  %v761_v49 = vmul.f32 %v3599_v40, %v740_v13  ;;  %v731_v50 = vsel %vm730_vm5, %v699_v15, %v715_v46  ;;  %v739_v51 = vsel %vm730_vm5, %v715_v46, %v699_v15 }
 0x12c   : > { %v758_v52 = vmul.f32 %v3596_v39, %v731_v50  ;;  %v759_v53 = vmul.f32 %v3599_v40, %v739_v51 }
 0x12d   : > { %v705_v55 = vpop.permute.xlu1 %704 }
 0x12e   : > { %v2547_v57 = vpack.c.bf16 %v760_v48, %v758_v52  ;;  %v703_v58 = vpop.permute.xlu0 %702  ;;  %v2545_v61 = vpack.c.bf16 %v761_v49, %v759_v53  ;;  %v274_v53 = vld [vmem:[%s5077_s1 + $0xe] sm:$0x3] }
 0x130   : > { %2546 = vmatprep.subr.bf16.mxu0 %v2545_v61  ;;  %v3681_v61 = vrot.slane %v274_v53, %v3086_v19 }
 0x131   : > { %2548 = vmatpush1.bf16.msra.mxu0 %v2547_v57  ;;  %v721_v63 = vpop.permute.xlu1 %720 }
 0x132   : > { %v734_v17 = vsel %vm730_vm5, %v705_v55, %v721_v63  ;;  %v742_v0 = vsel %vm730_vm5, %v721_v63, %v705_v55  ;;  %v719_v2 = vpop.permute.xlu0 %718  ;;  %5126 = vst [vmem:[#allocation9_spill] sm:$0xff] %v3681_v61 }
 0x133   : > { %v764_v20 = vmul.f32 %v3596_v39, %v734_v17  ;;  %v765_v1 = vmul.f32 %v3599_v40, %v742_v0  ;;  %v733_v3 = vsel %vm730_vm5, %v703_v58, %v719_v2  ;;  %v741_v6 = vsel %vm730_vm5, %v719_v2, %v703_v58 }
 0x134   : > { %v762_v7 = vmul.f32 %v3596_v39, %v733_v3  ;;  %v763_v22 = vmul.f32 %v3599_v40, %v741_v6  ;;  %v3678_v58 = vrot.slane %v274_v53, %v3095_v21 }
 0x135   : > { %v709_v5 = vpop.permute.xlu1 %708 }
 0x136   : > { %v2551_v11 = vpack.c.bf16 %v764_v20, %v762_v7  ;;  %v707_v25 = vpop.permute.xlu0 %706  ;;  %v2549_v27 = vpack.c.bf16 %v765_v1, %v763_v22  ;;  %5125 = vst [vmem:[#allocation8_spill] sm:$0xff] %v3678_v58 }
 0x138   : > { %2550 = vmatprep.subr.bf16.mxu0 %v2549_v27 }
 0x139   : > { %2552 = vmatpush1.bf16.msra.mxu0 %v2551_v11  ;;  %v725_v29 = vpop.permute.xlu1 %724 }
 0x13a   : > { %v736_v30 = vsel %vm730_vm5, %v709_v5, %v725_v29  ;;  %v744_v31 = vsel %vm730_vm5, %v725_v29, %v709_v5  ;;  %v723_v8 = vpop.permute.xlu0 %722 }
 0x13b   : > { %v768_v9 = vmul.f32 %v3596_v39, %v736_v30  ;;  %v769_v32 = vmul.f32 %v3599_v40, %v744_v31  ;;  %v735_v33 = vsel %vm730_vm5, %v707_v25, %v723_v8  ;;  %v743_v34 = vsel %vm730_vm5, %v723_v8, %v707_v25 }
 0x13c   : > { %v766_v14 = vmul.f32 %v3596_v39, %v735_v33  ;;  %v767_v15 = vmul.f32 %v3599_v40, %v743_v34 }
 0x13d   : > { %v713_v35 = vpop.permute.xlu1 %712 }
 0x13e   : > { %v2555_v38 = vpack.c.bf16 %v768_v9, %v766_v14  ;;  %v711_v43 = vpop.permute.xlu0 %710  ;;  %v2553_v44 = vpack.c.bf16 %v769_v32, %v767_v15 }
 0x140   : > { %2554 = vmatprep.subr.bf16.mxu0 %v2553_v44 }
 0x141   : > { %2556 = vmatpush1.bf16.msra.mxu0 %v2555_v38  ;;  %v729_v45 = vpop.permute.xlu1 %728 }
 0x142   : > { %v738_v12 = vsel %vm730_vm5, %v713_v35, %v729_v45  ;;  %v746_v13 = vsel %vm730_vm5, %v729_v45, %v713_v35  ;;  %v727_v46 = vpop.permute.xlu0 %726 }
 0x143   : > { %v772_v47 = vmul.f32 %v3596_v39, %v738_v12  ;;  %v773_v48 = vmul.f32 %v3599_v40, %v746_v13  ;;  %v737_v49 = vsel %vm730_vm5, %v711_v43, %v727_v46  ;;  %v745_v50 = vsel %vm730_vm5, %v727_v46, %v711_v43 }
 0x144   : > { %v770_v51 = vmul.f32 %v3596_v39, %v737_v49  ;;  %v771_v52 = vmul.f32 %v3599_v40, %v745_v50 }
 0x145   : > { %v777_v54 = vpop.permute.xlu1 %776 }
 0x146   : > { %v2559_v55 = vpack.c.bf16 %v772_v47, %v770_v51  ;;  %v775_v56 = vpop.permute.xlu0 %774  ;;  %v2557_v57 = vpack.c.bf16 %v773_v48, %v771_v52 }
 0x148   : > { %2558 = vmatprep.subr.bf16.mxu0 %v2557_v57 }
 0x149   : > { %2560 = vmatpush1.bf16.msra.mxu0 %v2559_v55  ;;  %v793_v62 = vpop.permute.xlu1 %792 }
 0x14a   : > { %v808_v63 = vsel %vm806_vm6, %v777_v54, %v793_v62  ;;  %v816_v16 = vsel %vm806_vm6, %v793_v62, %v777_v54  ;;  %v791_v17 = vpop.permute.xlu0 %790 }
 0x14b   : > { %v836_v0 = vmul.f32 %v3678_v58, %v808_v63  ;;  %v837_v2 = vmul.f32 %v3681_v61, %v816_v16  ;;  %v807_v20 = vsel %vm806_vm6, %v775_v56, %v791_v17  ;;  %v815_v1 = vsel %vm806_vm6, %v791_v17, %v775_v56 }
 0x14c   : > { %v834_v3 = vmul.f32 %v3678_v58, %v807_v20  ;;  %v835_v6 = vmul.f32 %v3681_v61, %v815_v1 }
 0x14d   : > { %v781_v7 = vpop.permute.xlu1 %780 }
 0x14e   : > { %v2563_v22 = vpack.c.bf16 %v836_v0, %v834_v3  ;;  %v779_v23 = vpop.permute.xlu0 %778  ;;  %v2561_v5 = vpack.c.bf16 %v837_v2, %v835_v6  ;;  %v275_v2 = vld [vmem:[%s5077_s1 + $0x10] sm:$0x3] }
 0x150   : > { %2562 = vmatprep.subr.bf16.mxu0 %v2561_v5  ;;  %v278_v5 = vld [vmem:[%s5078_s2 + $0x10] sm:$0xff] }
 0x151   : > { %2564 = vmatpush1.bf16.msra.mxu0 %v2563_v22  ;;  %v797_v10 = vpop.permute.xlu1 %796  ;;  %v3739_v22 = vrot.slane %v275_v2, %v3086_v19 }
 0x152   : > { %v810_v11 = vsel %vm806_vm6, %v781_v7, %v797_v10  ;;  %v818_v25 = vsel %vm806_vm6, %v797_v10, %v781_v7  ;;  %v795_v27 = vpop.permute.xlu0 %794  ;;  %v3736_v7 = vrot.slane %v275_v2, %v3095_v21  ;;  %v284_v21 = vld [vmem:[%s5078_s2 + $0x40] sm:$0xff] }
 0x153   : > { %v840_v29 = vmul.f32 %v3678_v58, %v810_v11  ;;  %v841_v30 = vmul.f32 %v3681_v61, %v818_v25  ;;  %v809_v31 = vsel %vm806_vm6, %v779_v23, %v795_v27  ;;  %v817_v8 = vsel %vm806_vm6, %v795_v27, %v779_v23  ;;  %5128 = vst [vmem:[#allocation11_spill] sm:$0xff] %v3739_v22 }
 0x154   : > { %v838_v9 = vmul.f32 %v3678_v58, %v809_v31  ;;  %v839_v32 = vmul.f32 %v3681_v61, %v817_v8  ;;  %5127 = vst [vmem:[#allocation10_spill] sm:$0xff] %v3736_v7 }
 0x155   : > { %v785_v33 = vpop.permute.xlu1 %784 }
 0x156   : > { %v2567_v34 = vpack.c.bf16 %v840_v29, %v838_v9  ;;  %v783_v14 = vpop.permute.xlu0 %782  ;;  %v2565_v15 = vpack.c.bf16 %v841_v30, %v839_v32  ;;  %v283_v32 = vld [vmem:[%s5078_s2 + $0x38] sm:$0xff] }
 0x158   : > { %2566 = vmatprep.subr.bf16.mxu0 %v2565_v15  ;;  %v289_v15 = vld [vmem:[%s5078_s2 + $0x68] sm:$0xff] }
 0x159   : > { %2568 = vmatpush1.bf16.msra.mxu0 %v2567_v34  ;;  %v801_v35 = vpop.permute.xlu1 %800 }
 0x15a   : > { %v812_v38 = vsel %vm806_vm6, %v785_v33, %v801_v35  ;;  %v820_v43 = vsel %vm806_vm6, %v801_v35, %v785_v33  ;;  %v799_v44 = vpop.permute.xlu0 %798 }
 0x15b   : > { %v844_v45 = vmul.f32 %v3678_v58, %v812_v38  ;;  %v845_v12 = vmul.f32 %v3681_v61, %v820_v43  ;;  %v811_v13 = vsel %vm806_vm6, %v783_v14, %v799_v44  ;;  %v819_v46 = vsel %vm806_vm6, %v799_v44, %v783_v14  ;;  %v288_v38 = vld [vmem:[%s5078_s2 + $0x60] sm:$0xff] }
 0x15c   : > { %v842_v47 = vmul.f32 %v3678_v58, %v811_v13  ;;  %v843_v48 = vmul.f32 %v3681_v61, %v819_v46 }
 0x15d   : > { %v789_v49 = vpop.permute.xlu1 %788 }
 0x15e   : > { %v2571_v50 = vpack.c.bf16 %v844_v45, %v842_v47  ;;  %v787_v51 = vpop.permute.xlu0 %786  ;;  %v2569_v52 = vpack.c.bf16 %v845_v12, %v843_v48  ;;  %v294_v12 = vld [vmem:[%s5078_s2 + $0x90] sm:$0xff] }
 0x160   : > { %2570 = vmatprep.subr.bf16.mxu0 %v2569_v52  ;;  %v293_v52 = vld [vmem:[%s5078_s2 + $0x88] sm:$0xff] }
 0x161   : > { %2572 = vmatpush1.bf16.msra.mxu0 %v2571_v50  ;;  %v805_v53 = vpop.permute.xlu1 %804 }
 0x162   : > { %v814_v54 = vsel %vm806_vm6, %v789_v49, %v805_v53  ;;  %v822_v55 = vsel %vm806_vm6, %v805_v53, %v789_v49  ;;  %v803_v56 = vpop.permute.xlu0 %802 }
 0x163   : > { %v848_v57 = vmul.f32 %v3678_v58, %v814_v54  ;;  %v849_v62 = vmul.f32 %v3681_v61, %v822_v55  ;;  %v813_v63 = vsel %vm806_vm6, %v787_v51, %v803_v56  ;;  %v821_v16 = vsel %vm806_vm6, %v803_v56, %v787_v51  ;;  %v299_v56 = vld [vmem:[%s5078_s2 + $0xb8] sm:$0xff] }
 0x164   : > { %v846_v17 = vmul.f32 %v3678_v58, %v813_v63  ;;  %v847_v0 = vmul.f32 %v3681_v61, %v821_v16 }
 0x165   : > { %v853_v20 = vpop.permute.xlu1 %852 }
 0x166   : > { %v2575_v1 = vpack.c.bf16 %v848_v57, %v846_v17  ;;  %v851_v3 = vpop.permute.xlu0 %850  ;;  %v2573_v6 = vpack.c.bf16 %v849_v62, %v847_v0  ;;  %v298_v62 = vld [vmem:[%s5078_s2 + $0xb0] sm:$0xff]  ;;  %v304_v0 = vld [vmem:[%s5078_s2 + $0xe0] sm:$0xff] }
 0x168   : > { %2574 = vmatprep.subr.bf16.mxu0 %v2573_v6 }
 0x169   : > { %2576 = vmatpush1.bf16.msra.mxu0 %v2575_v1  ;;  %v869_v23 = vpop.permute.xlu1 %868 }
 0x16a   : > { %v884_v10 = vsel %vm882_vm7, %v853_v20, %v869_v23  ;;  %v892_v11 = vsel %vm882_vm7, %v869_v23, %v853_v20  ;;  %v867_v25 = vpop.permute.xlu0 %866 }
 0x16b   : > { %v912_v19 = vmul.f32 %v3736_v7, %v884_v10  ;;  %v913_v27 = vmul.f32 %v3739_v22, %v892_v11  ;;  %v883_v29 = vsel %vm882_vm7, %v851_v3, %v867_v25  ;;  %v891_v30 = vsel %vm882_vm7, %v867_v25, %v851_v3  ;;  %v303_v10 = vld [vmem:[%s5078_s2 + $0xd8] sm:$0xff] }
 0x16c   : > { %v910_v31 = vmul.f32 %v3736_v7, %v883_v29  ;;  %v911_v8 = vmul.f32 %v3739_v22, %v891_v30  ;;  %1177 = vmatmul.mubr.f32.vlgmr.msra.gmra.mrb[0].mxu0 %v278_v5  ;;  %v308_v29 = vld [vmem:[%s5078_s2 + $0x100] sm:$0xff] }
 0x16d   : > { %v857_v9 = vpop.permute.xlu1 %856  ;;  %1182 = vmatprep.mubr.f32.mxu0 %v284_v21 }
 0x16e   : > { %v2579_v33 = vpack.c.bf16 %v912_v19, %v910_v31  ;;  %v855_v34 = vpop.permute.xlu0 %854  ;;  %v2577_v14 = vpack.c.bf16 %v913_v27, %v911_v8  ;;  %v309_v19 = vld [vmem:[%s5078_s2 + $0x108] sm:$0xff] }
 0x170   : > { %1183 = vmatmul.mubr.f32.gmra.mrb[2].mxu0 %v283_v32  ;;  %2578 = vmatprep.subr.bf16.mxu0 %v2577_v14 }
 0x171   : > { %2580 = vmatpush1.bf16.msra.mxu0 %v2579_v33  ;;  %v873_v35 = vpop.permute.xlu1 %872  ;;  %1188 = vmatprep.mubr.f32.mxu0 %v289_v15 }
 0x172   : > { %v886_v43 = vsel %vm882_vm7, %v857_v9, %v873_v35  ;;  %v894_v44 = vsel %vm882_vm7, %v873_v35, %v857_v9  ;;  %v871_v45 = vpop.permute.xlu0 %870  ;;  %v314_v9 = vld [vmem:[%s5078_s2 + $0x130] sm:$0xff] }
 0x173   : > { %v916_v13 = vmul.f32 %v3736_v7, %v886_v43  ;;  %v917_v46 = vmul.f32 %v3739_v22, %v894_v44  ;;  %v885_v47 = vsel %vm882_vm7, %v855_v34, %v871_v45  ;;  %v893_v48 = vsel %vm882_vm7, %v871_v45, %v855_v34 }
 0x174   : > { %v914_v49 = vmul.f32 %v3736_v7, %v885_v47  ;;  %v915_v50 = vmul.f32 %v3739_v22, %v893_v48  ;;  %1189 = vmatmul.mubr.f32.gmra.mrb[4].mxu0 %v288_v38  ;;  %v313_v38 = vld [vmem:[%s5078_s2 + $0x128] sm:$0xff]  ;;  %v5083_v45 = vmov 0.0   ;;  %v295_v47 = vld [vmem:[%s5078_s2 + $0x98] sm:$0xff]  ;;  %v300_v48 = vld [vmem:[%s5078_s2 + $0xc0] sm:$0xff] }
 0x175   : > { %v861_v51 = vpop.permute.xlu1 %860  ;;  %1194 = vmatprep.mubr.f32.mxu0 %v294_v12  ;;  %v280_v12 = vld [vmem:[%s5078_s2 + $0x20] sm:$0xff] }
 0x176   : > { %v2583_v53 = vpack.c.bf16 %v916_v13, %v914_v49  ;;  %v859_v54 = vpop.permute.xlu0 %858  ;;  %v2581_v55 = vpack.c.bf16 %v917_v46, %v915_v50  ;;  %v285_v13 = vld [vmem:[%s5078_s2 + $0x48] sm:$0xff]  ;;  %v290_v46 = vld [vmem:[%s5078_s2 + $0x70] sm:$0xff] }
 0x177   : > { %v305_v49 = vld [vmem:[%s5078_s2 + $0xe8] sm:$0xff]  ;;  %v310_v50 = vld [vmem:[%s5078_s2 + $0x110] sm:$0xff] }
 0x178   : > { %1195 = vmatmul.mubr.f32.gmra.mrb[6].mxu0 %v293_v52  ;;  %2582 = vmatprep.subr.bf16.mxu0 %v2581_v55 }
 0x179   : > { %2584 = vmatpush1.bf16.msra.mxu0 %v2583_v53  ;;  %v877_v57 = vpop.permute.xlu1 %876  ;;  %1200 = vmatprep.mubr.f32.mxu0 %v299_v56 }
 0x17a   : > { %v888_v63 = vsel %vm882_vm7, %v861_v51, %v877_v57  ;;  %v896_v16 = vsel %vm882_vm7, %v877_v57, %v861_v51  ;;  %v875_v17 = vpop.permute.xlu0 %874  ;;  %v315_v51 = vld [vmem:[%s5078_s2 + $0x138] sm:$0xff] }
 0x17b   : > { %v920_v2 = vmul.f32 %v3736_v7, %v888_v63  ;;  %v921_v20 = vmul.f32 %v3739_v22, %v896_v16  ;;  %v887_v1 = vsel %vm882_vm7, %v859_v54, %v875_v17  ;;  %v895_v3 = vsel %vm882_vm7, %v875_v17, %v859_v54 }
 0x17c   : > { %v918_v6 = vmul.f32 %v3736_v7, %v887_v1  ;;  %v919_v23 = vmul.f32 %v3739_v22, %v895_v3  ;;  %1201 = vmatmul.mubr.f32.gmra.mrb[8].mxu0 %v298_v62 }
 0x17d   : > { %v865_v5 = vpop.permute.xlu1 %864  ;;  %1206 = vmatprep.mubr.f32.mxu0 %v304_v0 }
 0x17e   : > { %v2587_v11 = vpack.c.bf16 %v920_v2, %v918_v6  ;;  %v863_v25 = vpop.permute.xlu0 %862  ;;  %v2585_v21 = vpack.c.bf16 %v921_v20, %v919_v23 }
 0x180   : > { %1207 = vmatmul.mubr.f32.gmra.mrb[10].mxu0 %v303_v10  ;;  %2586 = vmatprep.subr.bf16.mxu0 %v2585_v21 }
 0x181   : > { %2588 = vmatpush1.bf16.msra.mxu0 %v2587_v11  ;;  %v881_v27 = vpop.permute.xlu1 %880  ;;  %1212 = vmatprep.mubr.f32.mxu0 %v309_v19 }
 0x182   : > { %v890_v30 = vsel %vm882_vm7, %v865_v5, %v881_v27  ;;  %v898_v31 = vsel %vm882_vm7, %v881_v27, %v865_v5  ;;  %v879_v8 = vpop.permute.xlu0 %878 }
 0x183   : > { %v924_v32 = vmul.f32 %v3736_v7, %v890_v30  ;;  %v925_v33 = vmul.f32 %v3739_v22, %v898_v31  ;;  %v889_v34 = vsel %vm882_vm7, %v863_v25, %v879_v8  ;;  %v897_v14 = vsel %vm882_vm7, %v879_v8, %v863_v25 }
 0x184   : > { %v922_v15 = vmul.f32 %v3736_v7, %v889_v34  ;;  %v923_v35 = vmul.f32 %v3739_v22, %v897_v14  ;;  %1213 = vmatmul.mubr.f32.gmra.mrb[12].mxu0 %v308_v29 }
 0x185   : > { %1218 = vmatprep.mubr.f32.mxu0 %v314_v9 }
 0x186   : > { %v2591_v43 = vpack.c.bf16 %v924_v32, %v922_v15  ;;  %v2589_v44 = vpack.c.bf16 %v925_v33, %v923_v35 }
 0x188   : > { %1219 = vmatmul.mubr.f32.gmra.mrb[14].mxu0 %v313_v38  ;;  %2590 = vmatprep.subr.bf16.mxu0 %v2589_v44 }
 0x189   : > { %2592 = vmatpush1.bf16.msra.mxu0 %v2591_v43  ;;  %1289 = vmatprep.mubr.f32.mxu0 %v5083_v45 }
 0x18c   : > { %2429 = vmatmul.mubr.msk.f32.vlgmr.msra.gmra.mrb[0].mxu0 %vm974_vm8, %v280_v12 }
 0x18d   : > { %1295 = vmatprep.mubr.f32.mxu0 %v5083_v45 }
 0x190   : > { %2430 = vmatmul.mubr.msk.f32.gmra.mrb[2].mxu0 %vm974_vm8, %v285_v13 }
 0x191   : > { %1301 = vmatprep.mubr.f32.mxu0 %v5083_v45 }
 0x194   : > { %2431 = vmatmul.mubr.msk.f32.gmra.mrb[4].mxu0 %vm974_vm8, %v290_v46 }
 0x195   : > { %1307 = vmatprep.mubr.f32.mxu0 %v5083_v45 }
 0x198   : > { %2432 = vmatmul.mubr.msk.f32.gmra.mrb[6].mxu0 %vm974_vm8, %v295_v47 }
 0x199   : > { %1313 = vmatprep.mubr.f32.mxu0 %v5083_v45 }
 0x19c   : > { %2433 = vmatmul.mubr.msk.f32.gmra.mrb[8].mxu0 %vm974_vm8, %v300_v48  ;;  %v942_v57 = vpop.permute.xlu1 %941 }
 0x19d   : > { %1319 = vmatprep.mubr.f32.mxu0 %v5083_v45  ;;  %v937_v52 = vpop.permute.xlu0 %936 }
 0x1a0   : > { %2434 = vmatmul.mubr.msk.f32.gmra.mrb[10].mxu0 %vm974_vm8, %v305_v49  ;;  %v947_v31 = vpop.permute.xlu1 %946 }
 0x1a1   : > { %1325 = vmatprep.mubr.f32.mxu0 %v5083_v45  ;;  %v952_v9 = vpop.permute.xlu0 %951 }
 0x1a4   : > { %2435 = vmatmul.mubr.msk.f32.gmra.mrb[12].mxu0 %vm974_vm8, %v310_v50  ;;  %v957_v43 = vpop.permute.xlu1 %956 }
 0x1a5   : > { %1331 = vmatprep.mubr.f32.mxu0 %v5083_v45  ;;  %v962_v12 = vpop.permute.xlu0 %961 }
 0x1a8   : > { %2436 = vmatmul.mubr.msk.f32.gmra.mrb[14].mxu0 %vm974_vm8, %v315_v51 }
 0x25f   : > { %v1291_v53 = vpop.f32.mrb[0].mxu0 }
 0x260   : > { %v2737_v54 = vadd.f32 %v1291_v53, %v937_v52  ;;  %v1293_v55 = vpop.f32.mrb[1].mxu0 }
 0x261   : > { %v2738_v3 = vadd.f32 %v1293_v55, %v937_v52  ;;  %v967_v52 = vpop.permute.xlu1 %966 }
 0x262   : > { %v3874_v56 = vmax.f32 %v2737_v54, 0.0  ;;  %v972_v54 = vpop.permute.xlu0 %971 }
 0x263   : > { %v1297_v62 = vpop.f32.mrb[2].mxu0  ;;  %v3892_v5 = vmax.f32 %v2738_v3, 0.0 }
 0x264   : > { %5129 = vst [vmem:[#allocation12_spill] sm:$0xff] %v3874_v56  ;;  %v2739_v63 = vadd.f32 %v1297_v62, %v942_v57  ;;  %v1299_v16 = vpop.f32.mrb[3].mxu0  ;;  %1394 = vrot.lane.b32.xlu1 %v3874_v56, %s2861_s27 }
 0x265   : > { %v2740_v10 = vadd.f32 %v1299_v16, %v942_v57 }
 0x266   : > { %v3878_v17 = vmax.f32 %v2739_v63, 0.0 }
 0x267   : > { %v1303_v0 = vpop.f32.mrb[4].mxu0  ;;  %v3898_v21 = vmax.f32 %v2740_v10, 0.0 }
 0x268   : > { %v1305_v2 = vpop.f32.mrb[5].mxu0  ;;  %1396 = vrot.lane.b32.xlu0 %v3878_v17, %s2861_s27  ;;  %1458 = vrot.lane.b32.xlu1 %v3874_v56, %s2862_s28  ;;  %v2741_v8 = vadd.f32 %v1303_v0, %v947_v31 }
 0x269   : > { %v2742_v14 = vadd.f32 %v1305_v2, %v947_v31 }
 0x26a   : > { %v3916_v32 = vmax.f32 %v2741_v8, 0.0 }
 0x26b   : > { %v1309_v20 = vpop.f32.mrb[6].mxu0  ;;  %v3936_v15 = vmax.f32 %v2742_v14, 0.0 }
 0x26c   : > { %v1311_v1 = vpop.f32.mrb[7].mxu0  ;;  %1460 = vrot.lane.b32.xlu0 %v3878_v17, %s2862_s28  ;;  %1522 = vrot.lane.b32.xlu1 %v3874_v56, %s2863_s29  ;;  %v2743_v33 = vadd.f32 %v1309_v20, %v952_v9 }
 0x26d   : > { %v2744_v35 = vadd.f32 %v1311_v1, %v952_v9 }
 0x26e   : > { %v3922_v34 = vmax.f32 %v2743_v33, 0.0 }
 0x26f   : > { %v1315_v6 = vpop.f32.mrb[8].mxu0  ;;  %v3942_v38 = vmax.f32 %v2744_v35, 0.0 }
 0x270   : > { %v1317_v23 = vpop.f32.mrb[9].mxu0  ;;  %1524 = vrot.lane.b32.xlu0 %v3878_v17, %s2863_s29  ;;  %1586 = vrot.lane.b32.xlu1 %v3874_v56, %s2864_s30  ;;  %v2745_v44 = vadd.f32 %v1315_v6, %v957_v43 }
 0x271   : > { %v2746_v48 = vadd.f32 %v1317_v23, %v957_v43 }
 0x272   : > { %v3956_v13 = vmax.f32 %v2745_v44, 0.0 }
 0x273   : > { %v1321_v11 = vpop.f32.mrb[10].mxu0  ;;  %v3976_v49 = vmax.f32 %v2746_v48, 0.0 }
 0x274   : > { %v1323_v25 = vpop.f32.mrb[11].mxu0  ;;  %1588 = vrot.lane.b32.xlu0 %v3878_v17, %s2864_s30  ;;  %1410 = vrot.lane.b32.xlu1 %v3892_v5, %s2861_s27  ;;  %v2747_v46 = vadd.f32 %v1321_v11, %v962_v12 }
 0x275   : > { %v2748_v50 = vadd.f32 %v1323_v25, %v962_v12 }
 0x276   : > { %v3962_v47 = vmax.f32 %v2747_v46, 0.0 }
 0x277   : > { %v1327_v19 = vpop.f32.mrb[12].mxu0  ;;  %v3982_v51 = vmax.f32 %v2748_v50, 0.0 }
 0x278   : > { %v3900_v27 = vpop.f32.mrb[13].mxu0  ;;  %1412 = vrot.lane.b32.xlu0 %v3898_v21, %s2861_s27  ;;  %1474 = vrot.lane.b32.xlu1 %v3892_v5, %s2862_s28  ;;  %v2749_v53 = vadd.f32 %v1327_v19, %v967_v52 }
 0x279   : > { %v2750_v63 = vadd.f32 %v3900_v27, %v967_v52 }
 0x27a   : > { %v3996_v55 = vmax.f32 %v2749_v53, 0.0 }
 0x27b   : > { %v1333_v29 = vpop.f32.mrb[14].mxu0  ;;  %v4013_v16 = vmax.f32 %v2750_v63, 0.0 }
 0x27c   : > { %v3906_v30 = vpop.f32.mrb[15].mxu0  ;;  %1476 = vrot.lane.b32.xlu0 %v3898_v21, %s2862_s28  ;;  %1538 = vrot.lane.b32.xlu1 %v3892_v5, %s2863_s29  ;;  %v2751_v57 = vadd.f32 %v1333_v29, %v972_v54 }
 0x27d   : > { %v2752_v0 = vadd.f32 %v3906_v30, %v972_v54 }
 0x27e   : > { %v4002_v62 = vmax.f32 %v2751_v57, 0.0 }
 0x27f   : > { %v4020_v2 = vmax.f32 %v2752_v0, 0.0 }
 0x280   : > { %1540 = vrot.lane.b32.xlu0 %v3898_v21, %s2863_s29  ;;  %1602 = vrot.lane.b32.xlu1 %v3892_v5, %s2864_s30 }
 0x284   : > { %1604 = vrot.lane.b32.xlu0 %v3898_v21, %s2864_s30  ;;  %1398 = vrot.lane.b32.xlu1 %v3916_v32, %s2861_s27 }
 0x288   : > { %1400 = vrot.lane.b32.xlu0 %v3922_v34, %s2861_s27  ;;  %1462 = vrot.lane.b32.xlu1 %v3916_v32, %s2862_s28 }
 0x28c   : > { %1464 = vrot.lane.b32.xlu0 %v3922_v34, %s2862_s28  ;;  %1526 = vrot.lane.b32.xlu1 %v3916_v32, %s2863_s29 }
 0x290   : > { %1528 = vrot.lane.b32.xlu0 %v3922_v34, %s2863_s29  ;;  %1590 = vrot.lane.b32.xlu1 %v3916_v32, %s2864_s30 }
 0x294   : > { %1592 = vrot.lane.b32.xlu0 %v3922_v34, %s2864_s30  ;;  %1414 = vrot.lane.b32.xlu1 %v3936_v15, %s2861_s27 }
 0x298   : > { %1416 = vrot.lane.b32.xlu0 %v3942_v38, %s2861_s27  ;;  %1478 = vrot.lane.b32.xlu1 %v3936_v15, %s2862_s28 }
 0x29c   : > { %1480 = vrot.lane.b32.xlu0 %v3942_v38, %s2862_s28  ;;  %1542 = vrot.lane.b32.xlu1 %v3936_v15, %s2863_s29 }
 0x2a0   : > { %1544 = vrot.lane.b32.xlu0 %v3942_v38, %s2863_s29  ;;  %1606 = vrot.lane.b32.xlu1 %v3936_v15, %s2864_s30 }
 0x2a4   : > { %1608 = vrot.lane.b32.xlu0 %v3942_v38, %s2864_s30  ;;  %1402 = vrot.lane.b32.xlu1 %v3956_v13, %s2861_s27 }
 0x2a8   : > { %1404 = vrot.lane.b32.xlu0 %v3962_v47, %s2861_s27  ;;  %1466 = vrot.lane.b32.xlu1 %v3956_v13, %s2862_s28 }
 0x2ac   : > { %1468 = vrot.lane.b32.xlu0 %v3962_v47, %s2862_s28  ;;  %1530 = vrot.lane.b32.xlu1 %v3956_v13, %s2863_s29 }
 0x2b0   : > { %1532 = vrot.lane.b32.xlu0 %v3962_v47, %s2863_s29  ;;  %1594 = vrot.lane.b32.xlu1 %v3956_v13, %s2864_s30 }
 0x2b4   : > { %1596 = vrot.lane.b32.xlu0 %v3962_v47, %s2864_s30  ;;  %1418 = vrot.lane.b32.xlu1 %v3976_v49, %s2861_s27 }
 0x2b8   : > { %1420 = vrot.lane.b32.xlu0 %v3982_v51, %s2861_s27  ;;  %1482 = vrot.lane.b32.xlu1 %v3976_v49, %s2862_s28 }
 0x2bc   : > { %1484 = vrot.lane.b32.xlu0 %v3982_v51, %s2862_s28  ;;  %1546 = vrot.lane.b32.xlu1 %v3976_v49, %s2863_s29 }
 0x2c0   : > { %1548 = vrot.lane.b32.xlu0 %v3982_v51, %s2863_s29  ;;  %1610 = vrot.lane.b32.xlu1 %v3976_v49, %s2864_s30 }
 0x2c4   : > { %1612 = vrot.lane.b32.xlu0 %v3982_v51, %s2864_s30  ;;  %1406 = vrot.lane.b32.xlu1 %v3996_v55, %s2861_s27 }
 0x2c8   : > { %1408 = vrot.lane.b32.xlu0 %v4002_v62, %s2861_s27  ;;  %1470 = vrot.lane.b32.xlu1 %v3996_v55, %s2862_s28 }
 0x2cc   : > { %1472 = vrot.lane.b32.xlu0 %v4002_v62, %s2862_s28  ;;  %1534 = vrot.lane.b32.xlu1 %v3996_v55, %s2863_s29 }
 0x2d0   : > { %1536 = vrot.lane.b32.xlu0 %v4002_v62, %s2863_s29  ;;  %1422 = vrot.lane.b32.xlu1 %v4013_v16, %s2861_s27 }
 0x2d4   : > { %1424 = vrot.lane.b32.xlu0 %v4020_v2, %s2861_s27  ;;  %1598 = vrot.lane.b32.xlu1 %v3996_v55, %s2864_s30 }
 0x2d6   : > { %v1395_v20 = vpop.permute.xlu1 %1394 }
 0x2d8   : > { %1600 = vrot.lane.b32.xlu0 %v4002_v62, %s2864_s30  ;;  %1486 = vrot.lane.b32.xlu1 %v4013_v16, %s2862_s28 }
 0x2da   : > { %v1397_v1 = vpop.permute.xlu0 %1396  ;;  %v4030_v3 = vpop.permute.xlu1 %1458 }
 0x2dc   : > { %1652 = vrot.lane.b32.xlu0 %v3878_v17, %s2865_s11  ;;  %1550 = vrot.lane.b32.xlu1 %v4013_v16, %s2863_s29 }
 0x2de   : > { %v4036_v6 = vpop.permute.xlu0 %1460  ;;  %v4038_v23 = vpop.permute.xlu1 %1522 }
 0x2e0   : > { %1668 = vrot.lane.b32.xlu0 %v3898_v21, %s2865_s11  ;;  %1614 = vrot.lane.b32.xlu1 %v4013_v16, %s2864_s30 }
 0x2e2   : > { %v4044_v10 = vpop.permute.xlu0 %1524  ;;  %v4046_v11 = vpop.permute.xlu1 %1586 }
 0x2e3   : > { %5130 = vst [vmem:[#allocation13_spill] sm:$0xff] %v4046_v11 }
 0x2e4   : > { %1488 = vrot.lane.b32.xlu0 %v4020_v2, %s2862_s28  ;;  %1650 = vrot.lane.b32.xlu1 %v3874_v56, %s2865_s11 }
 0x2e6   : > { %v4052_v25 = vpop.permute.xlu0 %1588  ;;  %v1411_v19 = vpop.permute.xlu1 %1410 }
 0x2e7   : > { %5131 = vst [vmem:[#allocation14_spill] sm:$0xff] %v4052_v25  ;;  %v1426_v27 = vsel %vm350_vm0, %v1395_v20, %v1411_v19  ;;  %v1434_v9 = vsel %vm350_vm0, %v1411_v19, %v1395_v20 }
 0x2e8   : > { %1656 = vrot.lane.b32.xlu0 %v3922_v34, %s2865_s11  ;;  %1666 = vrot.lane.b32.xlu1 %v3892_v5, %s2865_s11  ;;  %v1443_v33 = vmul.f32 %v1426_v27, %v3099_v24  ;;  %v1442_v46 = vmul.f32 %v1434_v9, %v3108_v26 }
 0x2ea   : > { %v1413_v29 = vpop.permute.xlu0 %1412  ;;  %v4060_v30 = vpop.permute.xlu1 %1474 }
 0x2eb   : > { %v1435_v31 = vsel %vm350_vm0, %v1413_v29, %v1397_v1  ;;  %v1427_v8 = vsel %vm350_vm0, %v1397_v1, %v1413_v29  ;;  %v1355_v1 = vld [vmem:[%s5080_s4 + $0x8] sm:$0xff] }
 0x2ec   : > { %1672 = vrot.lane.b32.xlu0 %v3942_v38, %s2865_s11  ;;  %1654 = vrot.lane.b32.xlu1 %v3916_v32, %s2865_s11  ;;  %v1445_v14 = vmul.f32 %v1427_v8, %v3099_v24  ;;  %v1444_v35 = vmul.f32 %v1435_v31, %v3108_v26 }
 0x2ed   : > { %1994 = vmatprep.mubr.f32.mxu1 %v1355_v1 }
 0x2ee   : > { %v4075_v43 = vpop.permute.xlu0 %1476  ;;  %v4077_v44 = vpop.permute.xlu1 %1538  ;;  %v2593_v12 = vpack.c.bf16 %v1445_v14, %v1443_v33  ;;  %v2595_v48 = vpack.c.bf16 %v1444_v35, %v1442_v46 }
 0x2f0   : > { %1660 = vrot.lane.b32.xlu0 %v3962_v47, %s2865_s11  ;;  %1670 = vrot.lane.b32.xlu1 %v3936_v15, %s2865_s11 }
 0x2f1   : > { %2594 = vmatprep.subr.bf16.mxu1 %v2593_v12 }
 0x2f2   : > { %v4084_v50 = vpop.permute.xlu0 %1540  ;;  %v4086_v52 = vpop.permute.xlu1 %1602  ;;  %2596 = vmatpush1.bf16.msra.mxu1 %v2595_v48 }
 0x2f3   : > { %5132 = vst [vmem:[#allocation15_spill] sm:$0xff] %v4086_v52 }
 0x2f4   : > { %1552 = vrot.lane.b32.xlu0 %v4020_v2, %s2863_s29  ;;  %1658 = vrot.lane.b32.xlu1 %v3956_v13, %s2865_s11 }
 0x2f6   : > { %v4092_v53 = vpop.permute.xlu0 %1604  ;;  %v1399_v54 = vpop.permute.xlu1 %1398 }
 0x2f8   : > { %1676 = vrot.lane.b32.xlu0 %v3982_v51, %s2865_s11  ;;  %1674 = vrot.lane.b32.xlu1 %v3976_v49, %s2865_s11 }
 0x2fa   : > { %v1401_v57 = vpop.permute.xlu0 %1400  ;;  %v4098_v63 = vpop.permute.xlu1 %1462 }
 0x2fc   : > { %1664 = vrot.lane.b32.xlu0 %v4002_v62, %s2865_s11  ;;  %1662 = vrot.lane.b32.xlu1 %v3996_v55, %s2865_s11 }
 0x2fe   : > { %v4104_v0 = vpop.permute.xlu0 %1464  ;;  %v4106_v20 = vpop.permute.xlu1 %1526 }
 0x300   : > { %1716 = vrot.lane.b32.xlu0 %v3878_v17, %s2866_s14  ;;  %1678 = vrot.lane.b32.xlu1 %v4013_v16, %s2865_s11 }
 0x302   : > { %v4115_v19 = vpop.permute.xlu0 %1528  ;;  %v4117_v27 = vpop.permute.xlu1 %1590 }
 0x303   : > { %5133 = vst [vmem:[#allocation16_spill] sm:$0xff] %v4117_v27 }
 0x304   : > { %1616 = vrot.lane.b32.xlu0 %v4020_v2, %s2864_s30  ;;  %1714 = vrot.lane.b32.xlu1 %v3874_v56, %s2866_s14 }
 0x306   : > { %v4123_v29 = vpop.permute.xlu0 %1592  ;;  %v1415_v31 = vpop.permute.xlu1 %1414 }
 0x307   : > { %5134 = vst [vmem:[#allocation17_spill] sm:$0xff] %v4123_v29  ;;  %v1428_v8 = vsel %vm350_vm0, %v1399_v54, %v1415_v31  ;;  %v1436_v9 = vsel %vm350_vm0, %v1415_v31, %v1399_v54 }
 0x308   : > { %1732 = vrot.lane.b32.xlu0 %v3898_v21, %s2866_s14  ;;  %1730 = vrot.lane.b32.xlu1 %v3892_v5, %s2866_s14  ;;  %v1446_v46 = vmul.f32 %v1436_v9, %v3108_v26  ;;  %v1447_v48 = vmul.f32 %v1428_v8, %v3099_v24 }
 0x30a   : > { %v1417_v33 = vpop.permute.xlu0 %1416  ;;  %v4133_v14 = vpop.permute.xlu1 %1478 }
 0x30b   : > { %v1429_v35 = vsel %vm350_vm0, %v1401_v57, %v1417_v33  ;;  %v1437_v12 = vsel %vm350_vm0, %v1417_v33, %v1401_v57 }
 0x30c   : > { %v1448_v1 = vmul.f32 %v1437_v12, %v3108_v26  ;;  %v1449_v54 = vmul.f32 %v1429_v35, %v3099_v24  ;;  %1720 = vrot.lane.b32.xlu0 %v3922_v34, %s2866_s14  ;;  %1718 = vrot.lane.b32.xlu1 %v3916_v32, %s2866_s14 }
 0x30e   : > { %v4147_v31 = vpop.permute.xlu0 %1480  ;;  %v4149_v45 = vpop.permute.xlu1 %1542  ;;  %v2597_v22 = vpack.c.bf16 %v1449_v54, %v1447_v48  ;;  %v2599_v57 = vpack.c.bf16 %v1448_v1, %v1446_v46 }
 0x310   : > { %1736 = vrot.lane.b32.xlu0 %v3942_v38, %s2866_s14  ;;  %1734 = vrot.lane.b32.xlu1 %v3936_v15, %s2866_s14 }
 0x311   : > { %2598 = vmatprep.subr.bf16.mxu1 %v2597_v22 }
 0x312   : > { %2600 = vmatpush1.bf16.msra.mxu1 %v2599_v57  ;;  %v4155_v8 = vpop.permute.xlu0 %1544  ;;  %v4157_v9 = vpop.permute.xlu1 %1606 }
 0x313   : > { %5135 = vst [vmem:[#allocation18_spill] sm:$0xff] %v4157_v9 }
 0x314   : > { %1724 = vrot.lane.b32.xlu0 %v3962_v47, %s2866_s14  ;;  %1722 = vrot.lane.b32.xlu1 %v3956_v13, %s2866_s14 }
 0x316   : > { %v4163_v33 = vpop.permute.xlu0 %1608  ;;  %v1403_v35 = vpop.permute.xlu1 %1402 }
 0x317   : > { %5136 = vst [vmem:[#allocation19_spill] sm:$0xff] %v4163_v33 }
 0x318   : > { %1740 = vrot.lane.b32.xlu0 %v3982_v51, %s2866_s14  ;;  %1738 = vrot.lane.b32.xlu1 %v3976_v49, %s2866_s14 }
 0x31a   : > { %v1405_v22 = vpop.permute.xlu0 %1404  ;;  %v4169_v12 = vpop.permute.xlu1 %1466 }
 0x31c   : > { %1728 = vrot.lane.b32.xlu0 %v4002_v62, %s2866_s14  ;;  %1726 = vrot.lane.b32.xlu1 %v3996_v55, %s2866_s14 }
 0x31e   : > { %v4175_v46 = vpop.permute.xlu0 %1468  ;;  %v4177_v48 = vpop.permute.xlu1 %1530 }
 0x320   : > { %1780 = vrot.lane.b32.xlu0 %v3878_v17, %s2867_s17  ;;  %1742 = vrot.lane.b32.xlu1 %v4013_v16, %s2866_s14 }
 0x322   : > { %v4183_v1 = vpop.permute.xlu0 %1532  ;;  %v1595_v54 = vpop.permute.xlu1 %1594 }
 0x324   : > { %1680 = vrot.lane.b32.xlu0 %v4020_v2, %s2865_s11  ;;  %1778 = vrot.lane.b32.xlu1 %v3874_v56, %s2867_s17 }
 0x326   : > { %v1597_v57 = vpop.permute.xlu0 %1596  ;;  %v1419_v7 = vpop.permute.xlu1 %1418 }
 0x327   : > { %v1430_v58 = vsel %vm350_vm0, %v1403_v35, %v1419_v7  ;;  %v1438_v61 = vsel %vm350_vm0, %v1419_v7, %v1403_v35 }
 0x328   : > { %1796 = vrot.lane.b32.xlu0 %v3898_v21, %s2867_s17  ;;  %1794 = vrot.lane.b32.xlu1 %v3892_v5, %s2867_s17  ;;  %v1450_v27 = vmul.f32 %v1438_v61, %v3108_v26  ;;  %v1451_v9 = vmul.f32 %v1430_v58, %v3099_v24 }
 0x32a   : > { %v1421_v39 = vpop.permute.xlu0 %1420  ;;  %v4197_v40 = vpop.permute.xlu1 %1482 }
 0x32b   : > { %v1431_v28 = vsel %vm350_vm0, %v1405_v22, %v1421_v39  ;;  %v1439_v4 = vsel %vm350_vm0, %v1421_v39, %v1405_v22 }
 0x32c   : > { %v1452_v29 = vmul.f32 %v1439_v4, %v3108_v26  ;;  %v1453_v7 = vmul.f32 %v1431_v28, %v3099_v24  ;;  %1784 = vrot.lane.b32.xlu0 %v3922_v34, %s2867_s17  ;;  %1782 = vrot.lane.b32.xlu1 %v3916_v32, %s2867_s17 }
 0x32e   : > { %v4211_v35 = vpop.permute.xlu0 %1484  ;;  %v4213_v33 = vpop.permute.xlu1 %1546  ;;  %v2601_v11 = vpack.c.bf16 %v1453_v7, %v1451_v9  ;;  %v2603_v39 = vpack.c.bf16 %v1452_v29, %v1450_v27 }
 0x330   : > { %1800 = vrot.lane.b32.xlu0 %v3942_v38, %s2867_s17  ;;  %1798 = vrot.lane.b32.xlu1 %v3936_v15, %s2867_s17 }
 0x331   : > { %2602 = vmatprep.subr.bf16.mxu1 %v2601_v11 }
 0x332   : > { %2604 = vmatpush1.bf16.msra.mxu1 %v2603_v39  ;;  %v4219_v4 = vpop.permute.xlu0 %1548  ;;  %v1611_v28 = vpop.permute.xlu1 %1610 }
 0x333   : > { %v1622_v58 = vsel %vm578_vm3, %v1595_v54, %v1611_v28  ;;  %v1630_v61 = vsel %vm578_vm3, %v1611_v28, %v1595_v54 }
 0x334   : > { %1744 = vrot.lane.b32.xlu0 %v4020_v2, %s2866_s14  ;;  %1786 = vrot.lane.b32.xlu1 %v3956_v13, %s2867_s17  ;;  %v4234_v22 = vmul.f32 %v1630_v61, %v3374_v36  ;;  %v4237_v7 = vmul.f32 %v1622_v58, %v3377_v37  ;;  %v1491_v58 = vsel %vm426_vm1, %v4036_v6, %v4075_v43 }
 0x336   : > { %v1613_v27 = vpop.permute.xlu0 %1612  ;;  %v1407_v29 = vpop.permute.xlu1 %1406  ;;  %5137 = vst [vmem:[#allocation20_spill] sm:$0xff] %v4234_v22  ;;  %5138 = vst [vmem:[#allocation21_spill] sm:$0xff] %v4237_v7  ;;  %v1490_v7 = vsel %vm426_vm1, %v4030_v3, %v4060_v30 }
 0x337   : > { %v1623_v11 = vsel %vm578_vm3, %v1597_v57, %v1613_v27  ;;  %v1631_v9 = vsel %vm578_vm3, %v1613_v27, %v1597_v57 }
 0x338   : > { %v4240_v39 = vmul.f32 %v1631_v9, %v3374_v36  ;;  %v4243_v54 = vmul.f32 %v1623_v11, %v3377_v37  ;;  %1788 = vrot.lane.b32.xlu0 %v3962_v47, %s2867_s17  ;;  %1802 = vrot.lane.b32.xlu1 %v3976_v49, %s2867_s17  ;;  %v1499_v37 = vsel %vm426_vm1, %v4075_v43, %v4036_v6 }
 0x339   : > { %v1493_v6 = vsel %vm426_vm1, %v4104_v0, %v4147_v31  ;;  %v1498_v43 = vsel %vm426_vm1, %v4060_v30, %v4030_v3 }
 0x33a   : > { %5139 = vst [vmem:[#allocation22_spill] sm:$0xff] %v4240_v39  ;;  %5140 = vst [vmem:[#allocation23_spill] sm:$0xff] %v4243_v54  ;;  %v1409_v28 = vpop.permute.xlu0 %1408  ;;  %v4249_v57 = vpop.permute.xlu1 %1470  ;;  %v1513_v3 = vmul.f32 %v1493_v6, %v3197_v42 }
 0x33c   : > { %1804 = vrot.lane.b32.xlu0 %v3982_v51, %s2867_s17  ;;  %1790 = vrot.lane.b32.xlu1 %v3996_v55, %s2867_s17 }
 0x33e   : > { %v4259_v27 = vpop.permute.xlu0 %1472  ;;  %v4261_v11 = vpop.permute.xlu1 %1534 }
 0x340   : > { %1792 = vrot.lane.b32.xlu0 %v4002_v62, %s2867_s17  ;;  %1806 = vrot.lane.b32.xlu1 %v4013_v16, %s2867_s17 }
 0x342   : > { %v4267_v9 = vpop.permute.xlu0 %1536  ;;  %v1423_v61 = vpop.permute.xlu1 %1422 }
 0x343   : > { %5141 = vst [vmem:[#allocation24_spill] sm:$0xff] %v4267_v9  ;;  %v1432_v22 = vsel %vm350_vm0, %v1407_v29, %v1423_v61  ;;  %v1440_v39 = vsel %vm350_vm0, %v1423_v61, %v1407_v29  ;;  %v1509_v9 = vmul.f32 %v1491_v58, %v3197_v42  ;;  %v1492_v58 = vsel %vm426_vm1, %v4098_v63, %v4133_v14 }
 0x344   : > { %1808 = vrot.lane.b32.xlu0 %v4020_v2, %s2867_s17  ;;  %1842 = vrot.lane.b32.xlu1 %v3874_v56, %s2868_s20  ;;  %v1454_v56 = vmul.f32 %v1440_v39, %v3108_v26  ;;  %v1455_v52 = vmul.f32 %v1432_v22, %v3099_v24  ;;  %v1511_v30 = vmul.f32 %v1492_v58, %v3197_v42 }
 0x346   : > { %v1425_v54 = vpop.permute.xlu0 %1424  ;;  %v4285_v36 = vpop.permute.xlu1 %1598 }
 0x347   : > { %5142 = vst [vmem:[#allocation25_spill] sm:$0xff] %v4285_v36  ;;  %v1433_v29 = vsel %vm350_vm0, %v1409_v28, %v1425_v54  ;;  %v1441_v61 = vsel %vm350_vm0, %v1425_v54, %v1409_v28  ;;  %v1508_v28 = vmul.f32 %v1499_v37, %v3194_v41  ;;  %v1495_v37 = vsel %vm426_vm1, %v4175_v46, %v4211_v35 }
 0x348   : > { %v1456_v25 = vmul.f32 %v1441_v61, %v3108_v26  ;;  %v1457_v36 = vmul.f32 %v1433_v29, %v3099_v24  ;;  %1844 = vrot.lane.b32.xlu0 %v3878_v17, %s2868_s20  ;;  %1858 = vrot.lane.b32.xlu1 %v3892_v5, %s2868_s20  ;;  %v1507_v26 = vmul.f32 %v1490_v7, %v3197_v42 }
 0x349   : > { %v1501_v29 = vsel %vm426_vm1, %v4147_v31, %v4104_v0  ;;  %v1494_v7 = vsel %vm426_vm1, %v4169_v12, %v4197_v40  ;;  %v2613_v61 = vpack.c.bf16 %v1513_v3, %v1511_v30  ;;  %v1554_v3 = vsel %vm502_vm2, %v4038_v23, %v4077_v44 }
 0x34a   : > { %v4313_v22 = vpop.permute.xlu0 %1600  ;;  %v1487_v24 = vpop.permute.xlu1 %1486  ;;  %v2605_v39 = vpack.c.bf16 %v1457_v36, %v1455_v52  ;;  %v2607_v54 = vpack.c.bf16 %v1456_v25, %v1454_v56  ;;  %v2609_v36 = vpack.c.bf16 %v1509_v9, %v1507_v26  ;;  %v1506_v56 = vmul.f32 %v1498_v43, %v3194_v41 }
 0x34b   : > { %v1500_v25 = vsel %vm426_vm1, %v4133_v14, %v4098_v63  ;;  %v1512_v31 = vmul.f32 %v1501_v29, %v3194_v41  ;;  %v1503_v63 = vsel %vm426_vm1, %v4211_v35, %v4175_v46  ;;  %v1517_v14 = vmul.f32 %v1495_v37, %v3197_v42 }
 0x34c   : > { %1860 = vrot.lane.b32.xlu0 %v3898_v21, %s2868_s20  ;;  %2606 = vmatprep.subr.bf16.mxu1 %v2605_v39  ;;  %v2611_v9 = vpack.c.bf16 %v1508_v28, %v1506_v56  ;;  %v1510_v6 = vmul.f32 %v1500_v25, %v3194_v41  ;;  %v1502_v43 = vsel %vm426_vm1, %v4197_v40, %v4169_v12 }
 0x34d   : > { %1846 = vrot.lane.b32.xlu1 %v3916_v32, %s2868_s20  ;;  %2608 = vmatpush1.bf16.msra.mxu1 %v2607_v54  ;;  %v1515_v26 = vmul.f32 %v1494_v7, %v3197_v42  ;;  %v1516_v39 = vmul.f32 %v1503_v63, %v3194_v41  ;;  %v1555_v28 = vsel %vm502_vm2, %v4044_v10, %v4084_v50 }
 0x34e   : > { %v4339_v52 = vpop.permute.xlu0 %1652  ;;  %2610 = vmatprep.subr.bf16.mxu1 %v2609_v36  ;;  %v4341_v0 = vpop.permute.xlu1 %1550  ;;  %v2615_v54 = vpack.c.bf16 %v1512_v31, %v1510_v6  ;;  %v1514_v40 = vmul.f32 %v1502_v43, %v3194_v41  ;;  %v1496_v12 = vsel %vm426_vm1, %v4249_v57, %v1487_v24  ;;  %v1504_v29 = vsel %vm426_vm1, %v1487_v24, %v4249_v57 }
 0x34f   : > { %v2617_v58 = vpack.c.bf16 %v1517_v14, %v1515_v26  ;;  %v1563_v36 = vsel %vm502_vm2, %v4084_v50, %v4044_v10  ;;  %v1573_v57 = vmul.f32 %v1555_v28, %v3287_v60  ;;  %v1518_v31 = vmul.f32 %v1504_v29, %v3194_v41 }
 0x350   : > { %1848 = vrot.lane.b32.xlu0 %v3922_v34, %s2868_s20  ;;  %v2619_v30 = vpack.c.bf16 %v1516_v39, %v1514_v40  ;;  %v1519_v7 = vmul.f32 %v1496_v12, %v3197_v42  ;;  %v1572_v6 = vmul.f32 %v1563_v36, %v3284_v59  ;;  %v1556_v43 = vsel %vm502_vm2, %v4106_v20, %v4149_v45 }
 0x351   : > { %1862 = vrot.lane.b32.xlu1 %v3936_v15, %s2868_s20  ;;  %2612 = vmatpush1.bf16.msra.mxu1 %v2611_v9  ;;  %v1557_v9 = vsel %vm502_vm2, %v4115_v19, %v4155_v8  ;;  %v1558_v12 = vsel %vm502_vm2, %v4177_v48, %v4213_v33 }
 0x352   : > { %v4363_v46 = vpop.permute.xlu0 %1668  ;;  %2614 = vmatprep.subr.bf16.mxu1 %v2613_v61  ;;  %v4365_v35 = vpop.permute.xlu1 %1614 }
 0x354   : > { %1864 = vrot.lane.b32.xlu0 %v3942_v38, %s2868_s20 }
 0x355   : > { %1850 = vrot.lane.b32.xlu1 %v3956_v13, %s2868_s20  ;;  %2616 = vmatpush1.bf16.msra.mxu1 %v2615_v54  ;;  %v1559_v54 = vsel %vm502_vm2, %v4183_v1, %v4219_v4 }
 0x356   : > { %v1489_v56 = vpop.permute.xlu0 %1488  ;;  %2618 = vmatprep.subr.bf16.mxu1 %v2617_v58  ;;  %v4391_v37 = vpop.permute.xlu1 %1650 }
 0x357   : > { %v1497_v24 = vsel %vm426_vm1, %v4259_v27, %v1489_v56  ;;  %v1505_v25 = vsel %vm426_vm1, %v1489_v56, %v4259_v27  ;;  %v1562_v27 = vsel %vm502_vm2, %v4077_v44, %v4038_v23  ;;  %v1565_v23 = vsel %vm502_vm2, %v4155_v8, %v4115_v19 }
 0x358   : > { %v1520_v10 = vmul.f32 %v1505_v25, %v3194_v41  ;;  %v1521_v50 = vmul.f32 %v1497_v24, %v3197_v42  ;;  %1852 = vrot.lane.b32.xlu0 %v3962_v47, %s2868_s20  ;;  %v1571_v41 = vmul.f32 %v1554_v3, %v3287_v60  ;;  %v1577_v44 = vmul.f32 %v1557_v9, %v3287_v60 }
 0x359   : > { %1866 = vrot.lane.b32.xlu1 %v3976_v49, %s2868_s20  ;;  %2620 = vmatpush1.bf16.msra.mxu1 %v2619_v30  ;;  %v1570_v39 = vmul.f32 %v1562_v27, %v3284_v59  ;;  %v1564_v19 = vsel %vm502_vm2, %v4149_v45, %v4106_v20  ;;  %v1575_v8 = vmul.f32 %v1556_v43, %v3287_v60 }
 0x35a   : > { %v4417_v42 = vpop.permute.xlu0 %1656  ;;  %v4419_v63 = vpop.permute.xlu1 %1666  ;;  %v2621_v14 = vpack.c.bf16 %v1521_v50, %v1519_v7  ;;  %v2623_v61 = vpack.c.bf16 %v1520_v10, %v1518_v31  ;;  %v2625_v26 = vpack.c.bf16 %v1573_v57, %v1571_v41  ;;  %v1576_v40 = vmul.f32 %v1565_v23, %v3284_v59  ;;  %v2286_v10 = vld [vmem:[%s5081_s5 + $0x8] sm:$0xff]  ;;  %v5143_v50 = vld [vmem:[#allocation14_spill] sm:$0xff]  ;;  %v2287_v41 = vld [vmem:[%s5081_s5 + $0x10] sm:$0xff] }
 0x35b   : > { %v2627_v29 = vpack.c.bf16 %v1572_v6, %v1570_v39  ;;  %v1567_v45 = vsel %vm502_vm2, %v4219_v4, %v4183_v1  ;;  %v1581_v20 = vmul.f32 %v1559_v54, %v3287_v60  ;;  %v2629_v3 = vpack.c.bf16 %v1577_v44, %v1575_v8  ;;  %v2285_v4 = vld [vmem:[%s5081_s5] sm:$0xff] }
 0x35c   : > { %1868 = vrot.lane.b32.xlu0 %v3982_v51, %s2868_s20  ;;  %2622 = vmatprep.subr.bf16.mxu1 %v2621_v14  ;;  %v1574_v36 = vmul.f32 %v1564_v19, %v3284_v59  ;;  %v1566_v56 = vsel %vm502_vm2, %v4213_v33, %v4177_v48  ;;  %v1579_v57 = vmul.f32 %v1558_v12, %v3287_v60  ;;  %v5144_v14 = vld [vmem:[#allocation15_spill] sm:$0xff] }
 0x35d   : > { %1854 = vrot.lane.b32.xlu1 %v3996_v55, %s2868_s20  ;;  %2624 = vmatpush1.bf16.msra.mxu1 %v2623_v61  ;;  %v1580_v24 = vmul.f32 %v1567_v45, %v3284_v59  ;;  %v1578_v33 = vmul.f32 %v1566_v56, %v3284_v59  ;;  %v1560_v48 = vsel %vm502_vm2, %v4261_v11, %v4341_v0  ;;  %v5145_v61 = vld [vmem:[#allocation13_spill] sm:$0xff]  ;;  %v5148_v45 = vld [vmem:[#allocation19_spill] sm:$0xff] }
 0x35e   : > { %v4445_v28 = vpop.permute.xlu0 %1672  ;;  %2626 = vmatprep.subr.bf16.mxu1 %v2625_v26  ;;  %v4447_v58 = vpop.permute.xlu1 %1654  ;;  %v2631_v30 = vpack.c.bf16 %v1576_v40, %v1574_v36  ;;  %v2633_v31 = vpack.c.bf16 %v1581_v20, %v1579_v57  ;;  %v1568_v7 = vsel %vm502_vm2, %v4341_v0, %v4261_v11  ;;  %v1619_v9 = vsel %vm578_vm3, %v5143_v50, %v4092_v53  ;;  %v5146_v0 = vld [vmem:[#allocation24_spill] sm:$0xff]  ;;  %v5147_v40 = vld [vmem:[#allocation3_spill] sm:$0xff]  ;;  %v5149_v20 = vld [vmem:[#allocation17_spill] sm:$0xff] }
 0x35f   : > { %v1618_v11 = vsel %vm578_vm3, %v5145_v61, %v5144_v14  ;;  %v2635_v44 = vpack.c.bf16 %v1580_v24, %v1578_v33  ;;  %v1582_v26 = vmul.f32 %v1568_v7, %v3284_v59  ;;  %v1583_v39 = vmul.f32 %v1560_v48, %v3287_v60  ;;  %v5150_v24 = vld [vmem:[#allocation2_spill] sm:$0xff]  ;;  %v5152_v33 = vld [vmem:[#allocation16_spill] sm:$0xff] }
 0x360   : > { %1856 = vrot.lane.b32.xlu0 %v4002_v62, %s2868_s20  ;;  %v1627_v8 = vsel %vm578_vm3, %v4092_v53, %v5143_v50  ;;  %v1637_v12 = vmul.f32 %v1619_v9, %v5147_v40  ;;  %v1626_v56 = vsel %vm578_vm3, %v5144_v14, %v5145_v61  ;;  %v1635_v57 = vmul.f32 %v1618_v11, %v5147_v40  ;;  %v2290_v9 = vld [vmem:[%s5081_s5 + $0x28] sm:$0xff]  ;;  %v2291_v14 = vld [vmem:[%s5081_s5 + $0x30] sm:$0xff] }
 0x361   : > { %1870 = vrot.lane.b32.xlu1 %v4013_v16, %s2868_s20  ;;  %2628 = vmatpush1.bf16.msra.mxu1 %v2627_v29  ;;  %v2288_v29 = vld [vmem:[%s5081_s5 + $0x18] sm:$0xff]  ;;  %v1629_v7 = vsel %vm578_vm3, %v5148_v45, %v5149_v20 }
 0x362   : > { %v4469_v1 = vpop.permute.xlu0 %1660  ;;  %2630 = vmatprep.subr.bf16.mxu1 %v2629_v3  ;;  %v4475_v25 = vpop.permute.xlu1 %1670  ;;  %v2289_v3 = vld [vmem:[%s5081_s5 + $0x20] sm:$0xff]  ;;  %v2641_v50 = vpack.c.bf16 %v1637_v12, %v1635_v57  ;;  %v5153_v12 = vld [vmem:[#allocation25_spill] sm:$0xff] }
 0x364   : > { %1872 = vrot.lane.b32.xlu0 %v4020_v2, %s2868_s20 }
 0x365   : > { %2295 = vperm.xlu1 %2836, %v2285_v4   ;;  %2632 = vmatpush1.bf16.msra.mxu1 %v2631_v30  ;;  %v1636_v30 = vmul.f32 %v1627_v8, %v5150_v24 }
 0x366   : > { %v1553_v27 = vpop.permute.xlu0 %1552  ;;  %2634 = vmatprep.subr.bf16.mxu1 %v2633_v31  ;;  %v4508_v23 = vpop.permute.xlu1 %1658  ;;  %v5151_v31 = vld [vmem:[#allocation18_spill] sm:$0xff] }
 0x367   : > { %v1561_v6 = vsel %vm502_vm2, %v5146_v0, %v1553_v27  ;;  %v1569_v43 = vsel %vm502_vm2, %v1553_v27, %v5146_v0  ;;  %v1620_v48 = vsel %vm578_vm3, %v5152_v33, %v5151_v31  ;;  %v1634_v27 = vmul.f32 %v1626_v56, %v5150_v24 }
 0x368   : > { %v1584_v54 = vmul.f32 %v1569_v43, %v3284_v59  ;;  %v1585_v19 = vmul.f32 %v1561_v6, %v3287_v60  ;;  %2300 = vperm.xlu0 %2835, %v2286_v10   ;;  %v1621_v59 = vsel %vm578_vm3, %v5149_v20, %v5148_v45  ;;  %v1628_v61 = vsel %vm578_vm3, %v5151_v31, %v5152_v33 }
 0x369   : > { %2305 = vperm.xlu1 %2836, %v2287_v41   ;;  %2636 = vmatpush1.bf16.msra.mxu1 %v2635_v44  ;;  %v1641_v10 = vmul.f32 %v1621_v59, %v5147_v40  ;;  %v1639_v11 = vmul.f32 %v1620_v48, %v5147_v40  ;;  %v1640_v6 = vmul.f32 %v1629_v7, %v5150_v24  ;;  %v5157_v48 = vld [vmem:[#allocation22_spill] sm:$0xff]  ;;  %v5158_v7 = vld [vmem:[#allocation20_spill] sm:$0xff] }
 0x36a   : > { %v4526_v60 = vpop.permute.xlu0 %1676  ;;  %v2637_v53 = vpack.c.bf16 %v1585_v19, %v1583_v39  ;;  %v2639_v36 = vpack.c.bf16 %v1584_v54, %v1582_v26  ;;  %v4536_v4 = vpop.permute.xlu1 %1674  ;;  %v2643_v43 = vpack.c.bf16 %v1636_v30, %v1634_v27  ;;  %v2292_v26 = vld [vmem:[%s5081_s5 + $0x38] sm:$0xff]  ;;  %v1638_v39 = vmul.f32 %v1628_v61, %v5150_v24 }
 0x36b   : > { %v2645_v44 = vpack.c.bf16 %v1641_v10, %v1639_v11  ;;  %v1632_v45 = vsel %vm578_vm3, %v4365_v35, %v5153_v12  ;;  %v5159_v10 = vpack.c.bf16 %v5157_v48, %v5158_v7  ;;  %v1360_v11 = vld [vmem:[%s5080_s4 + $0x30] sm:$0xff]  ;;  %v1687_v7 = vsel %vm654_vm4, %v4469_v1, %v4526_v60 }
 0x36c   : > { %2310 = vperm.xlu0 %2835, %v2288_v29   ;;  %2638 = vmatprep.subr.bf16.mxu1 %v2637_v53  ;;  %v2647_v8 = vpack.c.bf16 %v1640_v6, %v1638_v39  ;;  %v1624_v29 = vsel %vm578_vm3, %v5153_v12, %v4365_v35  ;;  %v5154_v53 = vld [vmem:[#allocation23_spill] sm:$0xff]  ;;  %v1646_v30 = vmul.f32 %v1632_v45, %v5150_v24  ;;  %v5160_v6 = vld [vmem:[#allocation12_spill] sm:$0xff]  ;;  %v1365_v39 = vld [vmem:[%s5080_s4 + $0x58] sm:$0xff] }
 0x36d   : > { %2315 = vperm.xlu1 %2836, %v2289_v3   ;;  %2640 = vmatpush1.bf16.msra.mxu1 %v2639_v36  ;;  %v5155_v36 = vld [vmem:[#allocation21_spill] sm:$0xff]  ;;  %v1647_v35 = vmul.f32 %v1624_v29, %v5147_v40  ;;  %v1364_v12 = vld [vmem:[%s5080_s4 + $0x50] sm:$0xff] }
 0x36e   : > { %v4552_v41 = vpop.permute.xlu0 %1664  ;;  %2642 = vmatprep.subr.bf16.mxu1 %v2641_v50  ;;  %v4562_v0 = vpop.permute.xlu1 %1662  ;;  %v5156_v56 = vpack.c.bf16 %v5154_v53, %v5155_v36  ;;  %v5161_v45 = vld [vmem:[#allocation4_spill] sm:$0xff] }
 0x370   : > { %2320 = vperm.xlu0 %2835, %v2290_v9  }
 0x371   : > { %2325 = vperm.xlu1 %2836, %v2291_v14   ;;  %2644 = vmatpush1.bf16.msra.mxu1 %v2643_v43  ;;  %v2657_v14 = vpack.c.bf16 %v3898_v21, %v3892_v5  ;;  %v2659_v43 = vpack.c.bf16 %v3878_v17, %v5160_v6  ;;  %v2661_v5 = vpack.c.bf16 %v3942_v38, %v3936_v15  ;;  %v1379_v6 = vld [vmem:[%s5080_s4 + $0xc8] sm:$0xff] }
 0x372   : > { %v4569_v54 = vpop.permute.xlu0 %1716  ;;  %2646 = vmatprep.subr.bf16.mxu1 %v2645_v44  ;;  %v4571_v19 = vpop.permute.xlu1 %1678  ;;  %v1359_v44 = vld [vmem:[%s5080_s4 + $0x28] sm:$0xff]  ;;  %v2663_v17 = vpack.c.bf16 %v3922_v34, %v3916_v32  ;;  %v2665_v15 = vpack.c.bf16 %v3982_v51, %v3976_v49  ;;  %v1690_v38 = vsel %vm654_vm4, %v4419_v63, %v4391_v37  ;;  %v1370_v32 = vld [vmem:[%s5080_s4 + $0x80] sm:$0xff]  ;;  %v1691_v34 = vsel %vm654_vm4, %v4363_v46, %v4339_v52 }
 0x373   : > { %v2667_v49 = vpack.c.bf16 %v3962_v47, %v3956_v13  ;;  %v1682_v51 = vsel %vm654_vm4, %v4391_v37, %v4419_v63  ;;  %v1369_v13 = vld [vmem:[%s5080_s4 + $0x78] sm:$0xff]  ;;  %v1683_v47 = vsel %vm654_vm4, %v4339_v52, %v4363_v46  ;;  %v1375_v37 = vld [vmem:[%s5080_s4 + $0xa8] sm:$0xff]  ;;  %v1684_v52 = vsel %vm654_vm4, %v4447_v58, %v4475_v25 }
 0x374   : > { %2330 = vperm.xlu0 %2835, %v2292_v26   ;;  %v5162_v63 = vld [vmem:[#allocation5_spill] sm:$0xff] }
 0x375   : > { %2648 = vmatpush1.bf16.msra.mxu1 %v2647_v8  ;;  %v1698_v36 = vmul.f32 %v1682_v51, %v5162_v63 }
 0x376   : > { %v1617_v20 = vpop.permute.xlu0 %1616  ;;  %2650 = vmatprep.subr.bf16.mxu1 %v5156_v56  ;;  %v4590_v57 = vpop.permute.xlu1 %1714  ;;  %v1693_v56 = vsel %vm654_vm4, %v4445_v28, %v4417_v42 }
 0x377   : > { %v1625_v59 = vsel %vm578_vm3, %v4313_v22, %v1617_v20  ;;  %v1633_v3 = vsel %vm578_vm3, %v1617_v20, %v4313_v22  ;;  %v1699_v20 = vmul.f32 %v1690_v38, %v5161_v45  ;;  %v1705_v48 = vmul.f32 %v1693_v56, %v5161_v45 }
 0x378   : > { %v1648_v31 = vmul.f32 %v1633_v3, %v5150_v24  ;;  %v1649_v33 = vmul.f32 %v1625_v59, %v5147_v40  ;;  %v1354_v40 = vld [vmem:[%s5080_s4] sm:$0xff]  ;;  %v2669_v59 = vpack.c.bf16 %v4020_v2, %v4013_v16  ;;  %v1692_v3 = vsel %vm654_vm4, %v4475_v25, %v4447_v58 }
 0x379   : > { %2652 = vmatpush1.bf16.msra.mxu1 %v5159_v10  ;;  %v1701_v16 = vmul.f32 %v1691_v34, %v5161_v45  ;;  %v1703_v46 = vmul.f32 %v1692_v3, %v5161_v45  ;;  %v1374_v58 = vld [vmem:[%s5080_s4 + $0xa0] sm:$0xff]  ;;  %v1685_v25 = vsel %vm654_vm4, %v4417_v42, %v4445_v28  ;;  %v1686_v10 = vsel %vm654_vm4, %v4508_v23, %v4536_v4 }
 0x37a   : > { %v4599_v50 = vpop.permute.xlu0 %1732  ;;  %v2653_v22 = vpack.c.bf16 %v1649_v33, %v1647_v35  ;;  %v2655_v9 = vpack.c.bf16 %v1648_v31, %v1646_v30  ;;  %v4601_v27 = vpop.permute.xlu1 %1730  ;;  %v2671_v30 = vpack.c.bf16 %v4002_v62, %v3996_v55  ;;  %v1700_v31 = vmul.f32 %v1683_v47, %v5162_v63  ;;  %v1390_v3 = vld [vmem:[%s5080_s4 + $0x120] sm:$0xff] }
 0x37b   : > { %v2673_v35 = vpack.c.bf16 %v1701_v16, %v1699_v20  ;;  %v1695_v33 = vsel %vm654_vm4, %v4526_v60, %v4469_v1  ;;  %v1694_v55 = vsel %vm654_vm4, %v4536_v4, %v4508_v23  ;;  %v1702_v28 = vmul.f32 %v1684_v52, %v5162_v63 }
 0x37c   : > { %2654 = vmatprep.subr.bf16.mxu1 %v2653_v22  ;;  %v2675_v42 = vpack.c.bf16 %v1700_v31, %v1698_v36  ;;  %v2677_v1 = vpack.c.bf16 %v1705_v48, %v1703_v46  ;;  %v1704_v60 = vmul.f32 %v1685_v25, %v5162_v63  ;;  %v1708_v23 = vmul.f32 %v1687_v7, %v5162_v63  ;;  %v5164_v46 = vld [vmem:[#allocation6_spill] sm:$0xff] }
 0x37d   : > { %2656 = vmatpush1.bf16.msra.mxu1 %v2655_v9  ;;  %v1380_v9 = vld [vmem:[%s5080_s4 + $0xd0] sm:$0xff]  ;;  %v1706_v4 = vmul.f32 %v1686_v10, %v5162_v63  ;;  %v1754_v38 = vsel %vm730_vm5, %v4601_v27, %v4590_v57  ;;  %v1746_v56 = vsel %vm730_vm5, %v4590_v57, %v4601_v27  ;;  %v1389_v57 = vld [vmem:[%s5080_s4 + $0x118] sm:$0xff] }
 0x37e   : > { %v4605_v61 = vpop.permute.xlu0 %1720  ;;  %2658 = vmatprep.subr.bf16.mxu1 %v2657_v14  ;;  %v4610_v24 = vpop.permute.xlu1 %1718  ;;  %v1709_v14 = vmul.f32 %v1695_v33, %v5161_v45  ;;  %v1357_v27 = vld [vmem:[%s5080_s4 + $0x18] sm:$0xff]  ;;  %v1762_v31 = vmul.f32 %v1746_v56, %v5164_v46 }
 0x380   : > { %1995 = vmatmul.mubr.f32.vlgmr.msra.gmra.mrb[0].mxu1 %v1354_v40  ;;  %v1707_v40 = vmul.f32 %v1694_v55, %v5161_v45 }
 0x381   : > { %2660 = vmatpush1.bf16.msra.mxu1 %v2659_v43  ;;  %2000 = vmatprep.mubr.f32.mxu1 %v1360_v11 }
 0x382   : > { %v4619_v21 = vpop.permute.xlu0 %1736  ;;  %v4624_v26 = vpop.permute.xlu1 %1734  ;;  %2662 = vmatprep.subr.bf16.mxu1 %v2661_v5  ;;  %v1385_v5 = vld [vmem:[%s5080_s4 + $0xf8] sm:$0xff] }
 0x383   : > { %v1749_v55 = vsel %vm730_vm5, %v4605_v61, %v4619_v21  ;;  %v1748_v25 = vsel %vm730_vm5, %v4610_v24, %v4624_v26 }
 0x384   : > { %2001 = vmatmul.mubr.f32.gmra.mrb[2].mxu1 %v1359_v44  ;;  %v2679_v44 = vpack.c.bf16 %v1704_v60, %v1702_v28  ;;  %v1766_v28 = vmul.f32 %v1748_v25, %v5164_v46 }
 0x385   : > { %2664 = vmatpush1.bf16.msra.mxu1 %v2663_v17  ;;  %2006 = vmatprep.mubr.f32.mxu1 %v1365_v39  ;;  %v1688_v39 = vsel %vm654_vm4, %v4562_v0, %v4571_v19  ;;  %v1696_v17 = vsel %vm654_vm4, %v4571_v19, %v4562_v0  ;;  %v1384_v0 = vld [vmem:[%s5080_s4 + $0xf0] sm:$0xff] }
 0x386   : > { %v4637_v8 = vpop.permute.xlu0 %1724  ;;  %v4642_v29 = vpop.permute.xlu1 %1722  ;;  %2666 = vmatprep.subr.bf16.mxu1 %v2665_v15  ;;  %v1755_v15 = vsel %vm730_vm5, %v4599_v50, %v4569_v54  ;;  %v1710_v19 = vmul.f32 %v1688_v39, %v5162_v63 }
 0x388   : > { %2007 = vmatmul.mubr.f32.gmra.mrb[4].mxu1 %v1364_v12  ;;  %v2681_v12 = vpack.c.bf16 %v1709_v14, %v1707_v40 }
 0x389   : > { %2668 = vmatpush1.bf16.msra.mxu1 %v2667_v49  ;;  %2012 = vmatprep.mubr.f32.mxu1 %v1370_v32  ;;  %v2683_v32 = vpack.c.bf16 %v1708_v23, %v1706_v4  ;;  %v1711_v49 = vmul.f32 %v1696_v17, %v5161_v45 }
 0x38a   : > { %v4664_v53 = vpop.permute.xlu0 %1740  ;;  %v4674_v2 = vpop.permute.xlu1 %1738  ;;  %2670 = vmatprep.subr.bf16.mxu1 %v2669_v59 }
 0x38b   : > { %v1759_v7 = vsel %vm730_vm5, %v4664_v53, %v4637_v8 }
 0x38c   : > { %2013 = vmatmul.mubr.f32.gmra.mrb[6].mxu1 %v1369_v13  ;;  %v5163_v13 = vld [vmem:[#allocation7_spill] sm:$0xff] }
 0x38d   : > { %2672 = vmatpush1.bf16.msra.mxu1 %v2671_v30  ;;  %2018 = vmatprep.mubr.f32.mxu1 %v1375_v37  ;;  %v1765_v47 = vmul.f32 %v1755_v15, %v5163_v13  ;;  %v1763_v16 = vmul.f32 %v1754_v38, %v5163_v13  ;;  %v1757_v30 = vsel %vm730_vm5, %v4619_v21, %v4605_v61 }
 0x38e   : > { %v4700_v62 = vpop.permute.xlu0 %1728  ;;  %v4718_v22 = vpop.permute.xlu1 %1726  ;;  %2674 = vmatprep.subr.bf16.mxu1 %v2673_v35  ;;  %v1758_v61 = vsel %vm730_vm5, %v4674_v2, %v4642_v29  ;;  %v1773_v14 = vmul.f32 %v1759_v7, %v5163_v13 }
 0x38f   : > { %v2689_v33 = vpack.c.bf16 %v1765_v47, %v1763_v16  ;;  %v1771_v40 = vmul.f32 %v1758_v61, %v5163_v13 }
 0x390   : > { %2019 = vmatmul.mubr.f32.gmra.mrb[8].mxu1 %v1374_v58  ;;  %v1769_v58 = vmul.f32 %v1757_v30, %v5163_v13 }
 0x391   : > { %2676 = vmatpush1.bf16.msra.mxu1 %v2675_v42  ;;  %2024 = vmatprep.mubr.f32.mxu1 %v1380_v9  ;;  %v1768_v42 = vmul.f32 %v1749_v55, %v5164_v46 }
 0x392   : > { %v4729_v11 = vpop.permute.xlu0 %1780  ;;  %v4734_v43 = vpop.permute.xlu1 %1742  ;;  %2678 = vmatprep.subr.bf16.mxu1 %v2677_v1 }
 0x393   : > { %v2695_v4 = vpack.c.bf16 %v1768_v42, %v1766_v28 }
 0x394   : > { %2025 = vmatmul.mubr.f32.gmra.mrb[10].mxu1 %v1379_v6 }
 0x395   : > { %2680 = vmatpush1.bf16.msra.mxu1 %v2679_v44  ;;  %2030 = vmatprep.mubr.f32.mxu1 %v1385_v5  ;;  %v2697_v44 = vpack.c.bf16 %v1773_v14, %v1771_v40 }
 0x396   : > { %v1681_v34 = vpop.permute.xlu0 %1680  ;;  %v4766_v59 = vpop.permute.xlu1 %1778  ;;  %2682 = vmatprep.subr.bf16.mxu1 %v2681_v12 }
 0x397   : > { %v1689_v51 = vsel %vm654_vm4, %v4552_v41, %v1681_v34  ;;  %v1697_v20 = vsel %vm654_vm4, %v1681_v34, %v4552_v41  ;;  %v1747_v41 = vsel %vm730_vm5, %v4569_v54, %v4599_v50 }
 0x398   : > { %v1712_v37 = vmul.f32 %v1689_v51, %v5162_v63  ;;  %v1713_v36 = vmul.f32 %v1697_v20, %v5161_v45  ;;  %2031 = vmatmul.mubr.f32.gmra.mrb[12].mxu1 %v1384_v0  ;;  %v1756_v45 = vsel %vm730_vm5, %v4624_v26, %v4610_v24  ;;  %v1764_v35 = vmul.f32 %v1747_v41, %v5164_v46 }
 0x399   : > { %2684 = vmatpush1.bf16.msra.mxu1 %v2683_v32  ;;  %2036 = vmatprep.mubr.f32.mxu1 %v1390_v3  ;;  %v1767_v48 = vmul.f32 %v1756_v45, %v5163_v13  ;;  %v1751_v24 = vsel %vm730_vm5, %v4637_v8, %v4664_v53  ;;  %v1750_v26 = vsel %vm730_vm5, %v4642_v29, %v4674_v2 }
 0x39a   : > { %v2687_v63 = vpack.c.bf16 %v1712_v37, %v1710_v19  ;;  %v1797_v52 = vpop.permute.xlu0 %1796  ;;  %v2685_v54 = vpack.c.bf16 %v1713_v36, %v1711_v49  ;;  %v1795_v50 = vpop.permute.xlu1 %1794  ;;  %v2691_v9 = vpack.c.bf16 %v1764_v35, %v1762_v31  ;;  %v1772_v60 = vmul.f32 %v1751_v24, %v5164_v46  ;;  %v5166_v37 = vld [vmem:[#allocation8_spill] sm:$0xff] }
 0x39b   : > { %v2693_v1 = vpack.c.bf16 %v1769_v58, %v1767_v48  ;;  %v1770_v8 = vmul.f32 %v1750_v26, %v5164_v46  ;;  %v1752_v29 = vsel %vm730_vm5, %v4718_v22, %v4734_v43  ;;  %v1760_v2 = vsel %vm730_vm5, %v4734_v43, %v4718_v22  ;;  %v5165_v43 = vld [vmem:[#allocation9_spill] sm:$0xff] }
 0x39c   : > { %2686 = vmatprep.subr.bf16.mxu1 %v2685_v54  ;;  %2037 = vmatmul.mubr.f32.gmra.mrb[14].mxu1 %v1389_v57  ;;  %v1819_v6 = vsel %vm806_vm6, %v1797_v52, %v4729_v11  ;;  %v1818_v5 = vsel %vm806_vm6, %v1795_v50, %v4766_v59  ;;  %v1774_v17 = vmul.f32 %v1752_v29, %v5164_v46 }
 0x39d   : > { %2688 = vmatpush1.bf16.msra.mxu1 %v2687_v63  ;;  %2107 = vmatprep.mubr.f32.mxu1 %v1357_v27  ;;  %v2699_v39 = vpack.c.bf16 %v1772_v60, %v1770_v8  ;;  %v1775_v15 = vmul.f32 %v1760_v2, %v5163_v13  ;;  %v1811_v22 = vsel %vm806_vm6, %v4729_v11, %v1797_v52 }
 0x39e   : > { %v1785_v21 = vpop.permute.xlu0 %1784  ;;  %v1783_v10 = vpop.permute.xlu1 %1782  ;;  %2690 = vmatprep.subr.bf16.mxu1 %v2689_v33  ;;  %v1829_v12 = vmul.f32 %v1819_v6, %v5165_v43  ;;  %v1810_v19 = vsel %vm806_vm6, %v4766_v59, %v1795_v50  ;;  %v1827_v49 = vmul.f32 %v1818_v5, %v5165_v43  ;;  %v1828_v36 = vmul.f32 %v1811_v22, %v5166_v37 }
 0x39f   : > { %v1826_v59 = vmul.f32 %v1810_v19, %v5166_v37 }
 0x3a0   : > { %v2705_v56 = vpack.c.bf16 %v1829_v12, %v1827_v49  ;;  %v5167_v12 = vld [vmem:[#allocation10_spill] sm:$0xff] }
 0x3a1   : > { %2692 = vmatpush1.bf16.msra.mxu1 %v2691_v9  ;;  %v2707_v54 = vpack.c.bf16 %v1828_v36, %v1826_v59  ;;  %v1366_v59 = vld [vmem:[%s5080_s4 + $0x60] sm:$0xff] }
 0x3a2   : > { %v1801_v53 = vpop.permute.xlu0 %1800  ;;  %v1799_v23 = vpop.permute.xlu1 %1798  ;;  %2694 = vmatprep.subr.bf16.mxu1 %v2693_v1 }
 0x3a3   : > { %v1821_v20 = vsel %vm806_vm6, %v1801_v53, %v1785_v21  ;;  %v1820_v3 = vsel %vm806_vm6, %v1799_v23, %v1783_v10  ;;  %v1812_v45 = vsel %vm806_vm6, %v1783_v10, %v1799_v23 }
 0x3a4   : > { %v1833_v30 = vmul.f32 %v1821_v20, %v5165_v43  ;;  %v1831_v63 = vmul.f32 %v1820_v3, %v5165_v43  ;;  %v1361_v20 = vld [vmem:[%s5080_s4 + $0x38] sm:$0xff] }
 0x3a5   : > { %2696 = vmatpush1.bf16.msra.mxu1 %v2695_v4 }
 0x3a6   : > { %v1745_v38 = vpop.permute.xlu0 %1744  ;;  %v1787_v0 = vpop.permute.xlu1 %1786  ;;  %2698 = vmatprep.subr.bf16.mxu1 %v2697_v44  ;;  %v2709_v55 = vpack.c.bf16 %v1833_v30, %v1831_v63  ;;  %v1372_v30 = vld [vmem:[%s5080_s4 + $0x90] sm:$0xff] }
 0x3a7   : > { %v1753_v32 = vsel %vm730_vm5, %v4700_v62, %v1745_v38  ;;  %v1761_v34 = vsel %vm730_vm5, %v1745_v38, %v4700_v62 }
 0x3a8   : > { %v1776_v11 = vmul.f32 %v1753_v32, %v5164_v46  ;;  %v1777_v51 = vmul.f32 %v1761_v34, %v5163_v13  ;;  %v1813_v13 = vsel %vm806_vm6, %v1785_v21, %v1801_v53  ;;  %v1830_v46 = vmul.f32 %v1812_v45, %v5166_v37  ;;  %v5168_v34 = vld [vmem:[#allocation11_spill] sm:$0xff] }
 0x3a9   : > { %2700 = vmatpush1.bf16.msra.mxu1 %v2699_v39  ;;  %v1832_v27 = vmul.f32 %v1813_v13, %v5166_v37 }
 0x3aa   : > { %v2703_v47 = vpack.c.bf16 %v1776_v11, %v1774_v17  ;;  %v1789_v62 = vpop.permute.xlu0 %1788  ;;  %v2701_v16 = vpack.c.bf16 %v1777_v51, %v1775_v15  ;;  %v1803_v41 = vpop.permute.xlu1 %1802  ;;  %v1356_v17 = vld [vmem:[%s5080_s4 + $0x10] sm:$0xff] }
 0x3ab   : > { %v1822_v35 = vsel %vm806_vm6, %v1803_v41, %v1787_v0  ;;  %v1814_v58 = vsel %vm806_vm6, %v1787_v0, %v1803_v41  ;;  %v2711_v21 = vpack.c.bf16 %v1832_v27, %v1830_v46  ;;  %v1371_v27 = vld [vmem:[%s5080_s4 + $0x88] sm:$0xff] }
 0x3ac   : > { %2702 = vmatprep.subr.bf16.mxu1 %v2701_v16  ;;  %v1835_v48 = vmul.f32 %v1822_v35, %v5165_v43  ;;  %v1834_v24 = vmul.f32 %v1814_v58, %v5166_v37 }
 0x3ad   : > { %2704 = vmatpush1.bf16.msra.mxu1 %v2703_v47 }
 0x3ae   : > { %v1805_v52 = vpop.permute.xlu0 %1804  ;;  %v1791_v50 = vpop.permute.xlu1 %1790  ;;  %2706 = vmatprep.subr.bf16.mxu1 %v2705_v56 }
 0x3af   : > { %v1823_v57 = vsel %vm806_vm6, %v1805_v52, %v1789_v62  ;;  %v1815_v31 = vsel %vm806_vm6, %v1789_v62, %v1805_v52  ;;  %v1367_v62 = vld [vmem:[%s5080_s4 + $0x68] sm:$0xff] }
 0x3b0   : > { %v1837_v33 = vmul.f32 %v1823_v57, %v5165_v43  ;;  %v1836_v7 = vmul.f32 %v1815_v31, %v5166_v37  ;;  %v1377_v31 = vld [vmem:[%s5080_s4 + $0xb8] sm:$0xff] }
 0x3b1   : > { %2708 = vmatpush1.bf16.msra.mxu1 %v2707_v54 }
 0x3b2   : > { %v1793_v25 = vpop.permute.xlu0 %1792  ;;  %v1807_v61 = vpop.permute.xlu1 %1806  ;;  %2710 = vmatprep.subr.bf16.mxu1 %v2709_v55  ;;  %v2713_v9 = vpack.c.bf16 %v1837_v33, %v1835_v48  ;;  %v2715_v28 = vpack.c.bf16 %v1836_v7, %v1834_v24 }
 0x3b3   : > { %v1816_v26 = vsel %vm806_vm6, %v1791_v50, %v1807_v61  ;;  %v1824_v10 = vsel %vm806_vm6, %v1807_v61, %v1791_v50 }
 0x3b4   : > { %v1838_v60 = vmul.f32 %v1816_v26, %v5166_v37  ;;  %v1839_v8 = vmul.f32 %v1824_v10, %v5165_v43 }
 0x3b5   : > { %2712 = vmatpush1.bf16.msra.mxu1 %v2711_v21  ;;  %v1382_v21 = vld [vmem:[%s5080_s4 + $0xe0] sm:$0xff] }
 0x3b6   : > { %v1809_v42 = vpop.permute.xlu0 %1808  ;;  %v1843_v1 = vpop.permute.xlu1 %1842  ;;  %2714 = vmatprep.subr.bf16.mxu1 %v2713_v9 }
 0x3b7   : > { %v1817_v14 = vsel %vm806_vm6, %v1793_v25, %v1809_v42  ;;  %v1825_v40 = vsel %vm806_vm6, %v1809_v42, %v1793_v25  ;;  %v1376_v25 = vld [vmem:[%s5080_s4 + $0xb0] sm:$0xff] }
 0x3b8   : > { %v1840_v53 = vmul.f32 %v1817_v14, %v5166_v37  ;;  %v1841_v29 = vmul.f32 %v1825_v40, %v5165_v43  ;;  %v1362_v43 = vld [vmem:[%s5080_s4 + $0x40] sm:$0xff]  ;;  %v1381_v14 = vld [vmem:[%s5080_s4 + $0xd8] sm:$0xff] }
 0x3b9   : > { %2716 = vmatpush1.bf16.msra.mxu1 %v2715_v28 }
 0x3ba   : > { %v2719_v2 = vpack.c.bf16 %v1840_v53, %v1838_v60  ;;  %v1845_v23 = vpop.permute.xlu0 %1844  ;;  %v2717_v4 = vpack.c.bf16 %v1841_v29, %v1839_v8  ;;  %v1859_v6 = vpop.permute.xlu1 %1858  ;;  %v1387_v60 = vld [vmem:[%s5080_s4 + $0x108] sm:$0xff] }
 0x3bb   : > { %v1874_v5 = vsel %vm882_vm7, %v1843_v1, %v1859_v6  ;;  %v1882_v44 = vsel %vm882_vm7, %v1859_v6, %v1843_v1  ;;  %v1392_v6 = vld [vmem:[%s5080_s4 + $0x130] sm:$0xff] }
 0x3bc   : > { %2718 = vmatprep.subr.bf16.mxu1 %v2717_v4  ;;  %v1890_v32 = vmul.f32 %v1874_v5, %v5167_v12  ;;  %v1891_v0 = vmul.f32 %v1882_v44, %v5168_v34 }
 0x3bd   : > { %2720 = vmatpush1.bf16.msra.mxu1 %v2719_v2  ;;  %v1386_v2 = vld [vmem:[%s5080_s4 + $0x100] sm:$0xff] }
 0x3be   : > { %v1861_v39 = vpop.permute.xlu0 %1860 }
 0x3bf   : > { %v1875_v15 = vsel %vm882_vm7, %v1845_v23, %v1861_v39  ;;  %v1883_v38 = vsel %vm882_vm7, %v1861_v39, %v1845_v23  ;;  %v1847_v22 = vpop.permute.xlu1 %1846 }
 0x3c0   : > { %v1892_v19 = vmul.f32 %v1875_v15, %v5167_v12  ;;  %v1893_v49 = vmul.f32 %v1883_v38, %v5168_v34  ;;  %2108 = vmatmul.mubr.f32.vlgmr.msra.gmra.mrb[0].mxu1 %v1356_v17 }
 0x3c1   : > { %2113 = vmatprep.mubr.f32.mxu1 %v1362_v43  ;;  %v1358_v43 = vld [vmem:[%s5080_s4 + $0x20] sm:$0xff] }
 0x3c2   : > { %v2723_v11 = vpack.c.bf16 %v1892_v19, %v1890_v32  ;;  %v1849_v51 = vpop.permute.xlu0 %1848  ;;  %v2721_v3 = vpack.c.bf16 %v1893_v49, %v1891_v0  ;;  %v1368_v32 = vld [vmem:[%s5080_s4 + $0x70] sm:$0xff]  ;;  %v1378_v0 = vld [vmem:[%s5080_s4 + $0xc0] sm:$0xff]  ;;  %v1383_v19 = vld [vmem:[%s5080_s4 + $0xe8] sm:$0xff] }
 0x3c3   : > { %v1863_v47 = vpop.permute.xlu1 %1862  ;;  %v1388_v49 = vld [vmem:[%s5080_s4 + $0x110] sm:$0xff] }
 0x3c4   : > { %2722 = vmatprep.subr.bf16.mxu1 %v2721_v3  ;;  %v1876_v16 = vsel %vm882_vm7, %v1847_v22, %v1863_v47  ;;  %v1884_v37 = vsel %vm882_vm7, %v1863_v47, %v1847_v22  ;;  %2114 = vmatmul.mubr.f32.gmra.mrb[2].mxu1 %v1361_v20  ;;  %v5169_v22 = vmov 0.0   ;;  %v2837_v20 = vld [vmem:[%s2922_s26] sm:$0xff] }
 0x3c5   : > { %2724 = vmatpush1.bf16.msra.mxu1 %v2723_v11  ;;  %2119 = vmatprep.mubr.f32.mxu1 %v1367_v62  ;;  %v1894_v45 = vmul.f32 %v1876_v16, %v5167_v12  ;;  %v1895_v63 = vmul.f32 %v1884_v37, %v5168_v34  ;;  %v1393_v11 = vld [vmem:[%s5080_s4 + $0x138] sm:$0xff]  ;;  %v2838_v16 = vld [vmem:[%s2922_s26 + $0x8] sm:$0xff] }
 0x3c6   : > { %v1865_v36 = vpop.permute.xlu0 %1864 }
 0x3c7   : > { %v1877_v41 = vsel %vm882_vm7, %v1849_v51, %v1865_v36  ;;  %v1885_v56 = vsel %vm882_vm7, %v1865_v36, %v1849_v51  ;;  %v1851_v13 = vpop.permute.xlu1 %1850 }
 0x3c8   : > { %v1896_v52 = vmul.f32 %v1877_v41, %v5167_v12  ;;  %v1897_v54 = vmul.f32 %v1885_v56, %v5168_v34  ;;  %2120 = vmatmul.mubr.f32.gmra.mrb[4].mxu1 %v1366_v59  ;;  %v2839_v56 = vld [vmem:[%s2922_s26 + $0x10] sm:$0xff] }
 0x3c9   : > { %2125 = vmatprep.mubr.f32.mxu1 %v1372_v30 }
 0x3ca   : > { %v2727_v57 = vpack.c.bf16 %v1896_v52, %v1894_v45  ;;  %v1853_v50 = vpop.permute.xlu0 %1852  ;;  %v2725_v46 = vpack.c.bf16 %v1897_v54, %v1895_v63  ;;  %v2840_v63 = vld [vmem:[%s2922_s26 + $0x18] sm:$0xff] }
 0x3cb   : > { %v1867_v35 = vpop.permute.xlu1 %1866 }
 0x3cc   : > { %2726 = vmatprep.subr.bf16.mxu1 %v2725_v46  ;;  %v1878_v33 = vsel %vm882_vm7, %v1851_v13, %v1867_v35  ;;  %v1886_v55 = vsel %vm882_vm7, %v1867_v35, %v1851_v13  ;;  %2126 = vmatmul.mubr.f32.gmra.mrb[6].mxu1 %v1371_v27  ;;  %v2841_v27 = vld [vmem:[%s2922_s26 + $0x20] sm:$0xff] }
 0x3cd   : > { %2728 = vmatpush1.bf16.msra.mxu1 %v2727_v57  ;;  %2131 = vmatprep.mubr.f32.mxu1 %v1377_v31  ;;  %v1898_v24 = vmul.f32 %v1878_v33, %v5167_v12  ;;  %v1899_v26 = vmul.f32 %v1886_v55, %v5168_v34  ;;  %v2842_v33 = vld [vmem:[%s2922_s26 + $0x28] sm:$0xff] }
 0x3ce   : > { %v1869_v58 = vpop.permute.xlu0 %1868 }
 0x3cf   : > { %v1879_v48 = vsel %vm882_vm7, %v1853_v50, %v1869_v58  ;;  %v1887_v7 = vsel %vm882_vm7, %v1869_v58, %v1853_v50  ;;  %v1855_v61 = vpop.permute.xlu1 %1854 }
 0x3d0   : > { %v1900_v10 = vmul.f32 %v1879_v48, %v5167_v12  ;;  %v1901_v9 = vmul.f32 %v1887_v7, %v5168_v34  ;;  %2132 = vmatmul.mubr.f32.gmra.mrb[8].mxu1 %v1376_v25  ;;  %v2843_v7 = vld [vmem:[%s2922_s26 + $0x30] sm:$0xff] }
 0x3d1   : > { %2137 = vmatprep.mubr.f32.mxu1 %v1382_v21 }
 0x3d2   : > { %v2731_v42 = vpack.c.bf16 %v1900_v10, %v1898_v24  ;;  %v1857_v28 = vpop.permute.xlu0 %1856  ;;  %v2729_v40 = vpack.c.bf16 %v1901_v9, %v1899_v26  ;;  %v2844_v26 = vld [vmem:[%s2922_s26 + $0x38] sm:$0xff] }
 0x3d3   : > { %v1871_v1 = vpop.permute.xlu1 %1870 }
 0x3d4   : > { %2730 = vmatprep.subr.bf16.mxu1 %v2729_v40  ;;  %v1880_v8 = vsel %vm882_vm7, %v1855_v61, %v1871_v1  ;;  %v1888_v53 = vsel %vm882_vm7, %v1871_v1, %v1855_v61  ;;  %2138 = vmatmul.mubr.f32.gmra.mrb[10].mxu1 %v1381_v14  ;;  %v2845_v14 = vld [vmem:[%s2922_s26 + $0x40] sm:$0xff] }
 0x3d5   : > { %2732 = vmatpush1.bf16.msra.mxu1 %v2731_v42  ;;  %2143 = vmatprep.mubr.f32.mxu1 %v1387_v60  ;;  %v1902_v5 = vmul.f32 %v1880_v8, %v5167_v12  ;;  %v1903_v44 = vmul.f32 %v1888_v53, %v5168_v34  ;;  %v2846_v8 = vld [vmem:[%s2922_s26 + $0x48] sm:$0xff] }
 0x3d6   : > { %v1873_v29 = vpop.permute.xlu0 %1872 }
 0x3d7   : > { %v1881_v23 = vsel %vm882_vm7, %v1857_v28, %v1873_v29  ;;  %v1889_v4 = vsel %vm882_vm7, %v1873_v29, %v1857_v28 }
 0x3d8   : > { %v1904_v39 = vmul.f32 %v1881_v23, %v5167_v12  ;;  %v1905_v17 = vmul.f32 %v1889_v4, %v5168_v34  ;;  %2144 = vmatmul.mubr.f32.gmra.mrb[12].mxu1 %v1386_v2  ;;  %v1363_v12 = vld [vmem:[%s5080_s4 + $0x48] sm:$0xff]  ;;  %v1373_v34 = vld [vmem:[%s5080_s4 + $0x98] sm:$0xff]  ;;  %v2847_v4 = vld [vmem:[%s2922_s26 + $0x50] sm:$0xff] }
 0x3d9   : > { %2149 = vmatprep.mubr.f32.mxu1 %v1392_v6 }
 0x3da   : > { %v2735_v15 = vpack.c.bf16 %v1904_v39, %v1902_v5  ;;  %v2733_v38 = vpack.c.bf16 %v1905_v17, %v1903_v44  ;;  %v2848_v39 = vld [vmem:[%s2922_s26 + $0x58] sm:$0xff] }
 0x3dc   : > { %2734 = vmatprep.subr.bf16.mxu1 %v2733_v38  ;;  %2150 = vmatmul.mubr.f32.gmra.mrb[14].mxu1 %v1391_v18 }
 0x3dd   : > { %2736 = vmatpush1.bf16.msra.mxu1 %v2735_v15  ;;  %2220 = vmatprep.mubr.f32.mxu1 %v5169_v22 }
 0x3e0   : > { %2437 = vmatmul.mubr.msk.f32.vlgmr.msra.gmra.mrb[0].mxu1 %vm974_vm8, %v1358_v43 }
 0x3e1   : > { %2226 = vmatprep.mubr.f32.mxu1 %v5169_v22 }
 0x3e4   : > { %2438 = vmatmul.mubr.msk.f32.gmra.mrb[2].mxu1 %vm974_vm8, %v1363_v12  ;;  %v2296_v62 = vpop.permute.xlu1 %2295 }
 0x3e5   : > { %2232 = vmatprep.mubr.f32.mxu1 %v5169_v22 }
 0x3e7   : > { %v2301_v45 = vpop.permute.xlu0 %2300 }
 0x3e8   : > { %2439 = vmatmul.mubr.msk.f32.gmra.mrb[4].mxu1 %vm974_vm8, %v1368_v32  ;;  %v2306_v31 = vpop.permute.xlu1 %2305 }
 0x3e9   : > { %2238 = vmatprep.mubr.f32.mxu1 %v5169_v22 }
 0x3eb   : > { %v2311_v24 = vpop.permute.xlu0 %2310 }
 0x3ec   : > { %2440 = vmatmul.mubr.msk.f32.gmra.mrb[6].mxu1 %vm974_vm8, %v1373_v34  ;;  %v2316_v60 = vpop.permute.xlu1 %2315  ;;  %v2850_v34 = vld [vmem:[%s2922_s26 + $0x68] sm:$0xff] }
 0x3ed   : > { %2244 = vmatprep.mubr.f32.mxu1 %v5169_v22 }
 0x3ef   : > { %v2321_v44 = vpop.permute.xlu0 %2320 }
 0x3f0   : > { %2441 = vmatmul.mubr.msk.f32.gmra.mrb[8].mxu1 %vm974_vm8, %v1378_v0  ;;  %v2326_v32 = vpop.permute.xlu1 %2325 }
 0x3f1   : > { %2250 = vmatprep.mubr.f32.mxu1 %v5169_v22 }
 0x3f4   : > { %2442 = vmatmul.mubr.msk.f32.gmra.mrb[10].mxu1 %vm974_vm8, %v1383_v19 }
 0x3f5   : > { %2256 = vmatprep.mubr.f32.mxu1 %v5169_v22 }
 0x3f8   : > { %2443 = vmatmul.mubr.msk.f32.gmra.mrb[12].mxu1 %vm974_vm8, %v1388_v49 }
 0x3f9   : > { %2262 = vmatprep.mubr.f32.mxu1 %v5169_v22  ;;  %v2849_v22 = vld [vmem:[%s2922_s26 + $0x60] sm:$0xff] }
 0x3fc   : > { %2444 = vmatmul.mubr.msk.f32.gmra.mrb[14].mxu1 %vm974_vm8, %v1393_v11 }
 0x4b3   : > { %v2222_v51 = vpop.f32.mrb[0].mxu1 }
 0x4b4   : > { %v2269_v3 = vadd.f32 %v2837_v20, %v2222_v51  ;;  %v2224_v47 = vpop.f32.mrb[1].mxu1  ;;  %v2851_v51 = vld [vmem:[%s2922_s26 + $0x70] sm:$0xff] }
 0x4b5   : > { %v2270_v37 = vadd.f32 %v2838_v16, %v2224_v47  ;;  %v2331_v47 = vpop.permute.xlu0 %2330 }
 0x4b6   : > { %v2333_v36 = vadd.f32 %v2296_v62, %v2269_v3 }
 0x4b7   : > { %v2334_v59 = vadd.f32 %v2296_v62, %v2270_v37  ;;  %v2228_v41 = vpop.f32.mrb[2].mxu1  ;;  %v2852_v62 = vld [vmem:[%s2922_s26 + $0x78] sm:$0xff] }
 0x4b8   : > { %2349 = vst [vmem:[%s5040_s9] sm:$0xff] %v2333_v36  ;;  %v2271_v13 = vadd.f32 %v2839_v56, %v2228_v41  ;;  %v2230_v30 = vpop.f32.mrb[3].mxu1 }
 0x4b9   : > { %2350 = vst [vmem:[%s5040_s9 + $0x8] sm:$0xff] %v2334_v59  ;;  %v2272_v52 = vadd.f32 %v2840_v63, %v2230_v30 }
 0x4ba   : > { %v2335_v54 = vadd.f32 %v2301_v45, %v2271_v13 }
 0x4bb   : > { %v2336_v57 = vadd.f32 %v2301_v45, %v2272_v52  ;;  %v2234_v50 = vpop.f32.mrb[4].mxu1 }
 0x4bc   : > { %2351 = vst [vmem:[%s5040_s9 + $0x10] sm:$0xff] %v2335_v54  ;;  %v2273_v46 = vadd.f32 %v2841_v27, %v2234_v50  ;;  %v2236_v35 = vpop.f32.mrb[5].mxu1 }
 0x4bd   : > { %2352 = vst [vmem:[%s5040_s9 + $0x18] sm:$0xff] %v2336_v57  ;;  %v2274_v55 = vadd.f32 %v2842_v33, %v2236_v35 }
 0x4be   : > { %v2337_v58 = vadd.f32 %v2306_v31, %v2273_v46 }
 0x4bf   : > { %v2338_v25 = vadd.f32 %v2306_v31, %v2274_v55  ;;  %v2240_v48 = vpop.f32.mrb[6].mxu1 }
 0x4c0   : > { %2353 = vst [vmem:[%s5040_s9 + $0x20] sm:$0xff] %v2337_v58  ;;  %v2275_v61 = vadd.f32 %v2843_v7, %v2240_v48  ;;  %v2242_v21 = vpop.f32.mrb[7].mxu1 }
 0x4c1   : > { %2354 = vst [vmem:[%s5040_s9 + $0x28] sm:$0xff] %v2338_v25  ;;  %v2276_v10 = vadd.f32 %v2844_v26, %v2242_v21 }
 0x4c2   : > { %v2339_v9 = vadd.f32 %v2311_v24, %v2275_v61 }
 0x4c3   : > { %v2340_v42 = vadd.f32 %v2311_v24, %v2276_v10  ;;  %v2246_v28 = vpop.f32.mrb[8].mxu1 }
 0x4c4   : > { %2355 = vst [vmem:[%s5040_s9 + $0x30] sm:$0xff] %v2339_v9  ;;  %v2277_v40 = vadd.f32 %v2845_v14, %v2246_v28  ;;  %v2248_v1 = vpop.f32.mrb[9].mxu1 }
 0x4c5   : > { %2356 = vst [vmem:[%s5040_s9 + $0x38] sm:$0xff] %v2340_v42  ;;  %v2278_v53 = vadd.f32 %v2846_v8, %v2248_v1 }
 0x4c6   : > { %v2341_v29 = vadd.f32 %v2316_v60, %v2277_v40 }
 0x4c7   : > { %v2342_v2 = vadd.f32 %v2316_v60, %v2278_v53  ;;  %v2252_v23 = vpop.f32.mrb[10].mxu1 }
 0x4c8   : > { %2357 = vst [vmem:[%s5040_s9 + $0x40] sm:$0xff] %v2341_v29  ;;  %v2279_v6 = vadd.f32 %v2847_v4, %v2252_v23  ;;  %v2254_v5 = vpop.f32.mrb[11].mxu1 }
 0x4c9   : > { %2358 = vst [vmem:[%s5040_s9 + $0x48] sm:$0xff] %v2342_v2  ;;  %v2280_v17 = vadd.f32 %v2848_v39, %v2254_v5 }
 0x4ca   : > { %v2343_v15 = vadd.f32 %v2321_v44, %v2279_v6 }
 0x4cb   : > { %v2344_v18 = vadd.f32 %v2321_v44, %v2280_v17  ;;  %v2258_v38 = vpop.f32.mrb[12].mxu1 }
 0x4cc   : > { %2359 = vst [vmem:[%s5040_s9 + $0x50] sm:$0xff] %v2343_v15  ;;  %v2281_v43 = vadd.f32 %v2849_v22, %v2258_v38  ;;  %v2260_v12 = vpop.f32.mrb[13].mxu1 }
 0x4cd   : > { %2360 = vst [vmem:[%s5040_s9 + $0x58] sm:$0xff] %v2344_v18  ;;  %v2282_v0 = vadd.f32 %v2850_v34, %v2260_v12 }
 0x4ce   : > { %v2345_v19 = vadd.f32 %v2326_v32, %v2281_v43 }
 0x4cf   : > { %v2346_v49 = vadd.f32 %v2326_v32, %v2282_v0  ;;  %v2264_v11 = vpop.f32.mrb[14].mxu1 }
 0x4d0   : > { %2361 = vst [vmem:[%s5040_s9 + $0x60] sm:$0xff] %v2345_v19  ;;  %v2283_v20 = vadd.f32 %v2851_v51, %v2264_v11  ;;  %v2266_v3 = vpop.f32.mrb[15].mxu1 }
 0x4d1   : > { %2362 = vst [vmem:[%s5040_s9 + $0x68] sm:$0xff] %v2346_v49  ;;  %v2284_v16 = vadd.f32 %v2852_v62, %v2266_v3 }
 0x4d2   : > { %v2347_v37 = vadd.f32 %v2331_v47, %v2283_v20 }
 0x4d3   : > { %v2348_v36 = vadd.f32 %v2331_v47, %v2284_v16 }
 0x4d4   : > { %2363 = vst [vmem:[%s5040_s9 + $0x70] sm:$0xff] %v2347_v37 }
 0x4d5   : > { %2364 = vst [vmem:[%s5040_s9 + $0x78] sm:$0xff] %v2348_v36 }
 0x4d6 PF: > { %s16_s21 = sadd.s32 1, %s2859_s21  }
 0x4d7   : > { %p13_p4 = scmp.ge.s32.totalorder %s16_s21, 4  }
 0x4d9   :  { %15 = sbr.rel (!%p13_p4) target bundleno = 1 (0x1), region = 74 }

</bundles_post_ra>
